<compile_context>
chip_gen: v7x
topology: tpu7x:2x2x1
jax: 0.10.0
libtpu: 0.0.40
codegen_flags: <defaults>
</compile_context>

<pallas_src>
import math

import jax
import jax.numpy as jnp
from jax.experimental import pallas as pl
from jax.experimental.pallas import tpu as pltpu

EPS = 1e-5


# ---------------------------------------------------------------------------
# Pallas kernel
# ---------------------------------------------------------------------------
def _make_kernel(TH, W, Cin, Hid, Oup, stride, nblk, HB, use_res):
    R = TH + 2                   # rows per block incl. 1-row halo each side
    THo = TH // stride           # output rows per block
    WC = W * Cin                 # lane-packed input width
    WH = W * Hid                 # lane-packed hidden width

    def kernel(x_ref, xt_ref, xb_ref, w1_ref, b1_ref, wdw_ref, b2_ref,
               w3_ref, b3_ref, o_ref, xs_ref, *extra_scratch):
        rb = pl.program_id(1)

        # Assemble [top halo row ; TH main rows ; bottom halo row] in a small
        # VMEM scratch (no HBM staging copy; halos come from neighbour blocks).
        xs_ref[0:1, :] = xt_ref[0, HB - 1:HB, :]
        xs_ref[1:1 + TH, :] = x_ref[0]
        xs_ref[1 + TH:R, :] = xb_ref[0, 0:1, :]

        # ---- Stage A: grouped 1x1 conv (BN1 scale folded) + bias + ReLU6 ---
        h1 = jnp.dot(xs_ref[...].astype(jnp.bfloat16), w1_ref[...],
                     preferred_element_type=jnp.float32)            # (R, WH)
        h1 = jnp.clip(h1 + b1_ref[...], 0.0, 6.0)

        # Depthwise zero-padding acts at the h1 level: halo rows that fall
        # outside the image must be zero.  Cheap (R,1) row predicate.
        riota = jax.lax.broadcasted_iota(jnp.int32, (R, 1), 0)
        pad_row = jnp.logical_or(
            jnp.logical_and(rb == 0, riota == 0),
            jnp.logical_and(rb == nblk - 1, riota == R - 1))
        h1 = jnp.where(pad_row, 0.0, h1)

        # ---- Stage B: depthwise 3x3 (BN2 scale folded) + bias + ReLU6 ------
        # Horizontal border masks are folded into wdw (zeroed tap columns), so
        # the lane wrap-around from the rolls is multiplied by zero weight.
        acc = jnp.zeros((THo, WH), jnp.float32)
        if stride == 1:
            h1L = pltpu.roll(h1, Hid, axis=1)        # value from column x-1
            h1R = pltpu.roll(h1, WH - Hid, axis=1)   # value from column x+1
            for dy in range(3):
                acc = acc + h1L[dy:dy + THo] * wdw_ref[3 * dy + 0:3 * dy + 1, :]
                acc = acc + h1[dy:dy + THo] * wdw_ref[3 * dy + 1:3 * dy + 2, :]
                acc = acc + h1R[dy:dy + THo] * wdw_ref[3 * dy + 2:3 * dy + 3, :]
        else:
            # TODO(synk): avoid the full h1 VMEM round trip (v5e store-slot
            # pressure) by in-register strided row selection.
            h1_scr = extra_scratch[0]
            h1_scr[...] = h1
            for dy in range(3):
                rows = h1_scr[pl.ds(dy, THo, stride=stride), :]
                acc = acc + (pltpu.roll(rows, Hid, axis=1)
                             * wdw_ref[3 * dy + 0:3 * dy + 1, :])
                acc = acc + rows * wdw_ref[3 * dy + 1:3 * dy + 2, :]
                acc = acc + (pltpu.roll(rows, WH - Hid, axis=1)
                             * wdw_ref[3 * dy + 2:3 * dy + 3, :])
        h2 = jnp.clip(acc + b2_ref[...], 0.0, 6.0)                  # (THo, WH)

        # ---- Stage C: grouped 1x1 conv (BN3 scale folded) + bias (+res) ----
        # W-subsampling for stride=2 is folded into the block-sparse weight.
        out = jnp.dot(h2.astype(jnp.bfloat16), w3_ref[...],
                      preferred_element_type=jnp.float32)           # (THo, WO)
        out = out + b3_ref[...]
        if use_res:
            out = out + x_ref[0]                                    # f32 residual
        o_ref[0] = out.astype(o_ref.dtype)

    return kernel


def _pick_th(H, row_block, stride):
    """Largest divisor of H that is <= row_block and a multiple of 8*stride."""
    q = 8 * stride
    best = None
    t = q
    while t <= min(row_block, H):
        if H % t == 0:
            best = t
        t += q
    return best if best is not None else H


def inverted_residual_pallas(x_nhwc, params, stride, use_res, row_block=128):
    N, H, W, Cin = x_nhwc.shape
    w1big, b1, wdwbig, b2, w3big, b3 = params
    WC = W * Cin
    WH = w1big.shape[1]
    Hid = WH // W
    WO = w3big.shape[1]
    Wo = (W - 1) // stride + 1
    Oup = WO // Wo

    assert H % stride == 0
    if use_res:
        assert stride == 1 and Cin == Oup, "residual needs stride==1, Cin==Oup"

    TH = _pick_th(H, row_block, stride)
    nblk = H // TH
    THo = TH // stride
    Ho = nblk * THo
    HB = 8 if H % 8 == 0 else H          # halo-row fetch granularity
    nHB = H // HB
    nb = TH // HB                        # main block size in HB-row units

    # Lane-packed rows; NO padded/stacked staging copy — the kernel reads the
    # halo rows straight from neighbouring row blocks of this same array.
    x_flat = x_nhwc.reshape(N, H, WC)

    kernel = _make_kernel(TH, W, Cin, Hid, Oup, stride, nblk, HB, use_res)

    def const_spec(a):
        zero = (0,) * a.ndim
        return pl.BlockSpec(a.shape, lambda n, r: zero)

    main_spec = pl.BlockSpec((1, TH, WC), lambda n, r: (n, r, 0))
    top_spec = pl.BlockSpec(
        (1, HB, WC), lambda n, r: (n, jnp.maximum(r * nb - 1, 0), 0))
    bot_spec = pl.BlockSpec(
        (1, HB, WC), lambda n, r: (n, jnp.minimum(r * nb + nb, nHB - 1), 0))

    scratch = [pltpu.VMEM((TH + 2, WC), jnp.float32)]
    if stride != 1:
        scratch.append(pltpu.VMEM((TH + 2, WH), jnp.float32))

    # VMEM budget from actual buffer sizes (double-buffered blocks + weights +
    # scratch + live f32 temporaries), clamped to a safe range for all gens.
    fp32 = 4
    blk_bytes = (TH * WC + 2 * HB * WC + THo * WO) * fp32
    wt_bytes = sum(int(math.prod(a.shape)) * a.dtype.itemsize
                   for a in (w1big, b1, wdwbig, b2, w3big, b3))
    scr_bytes = (TH + 2) * WC * fp32 + ((TH + 2) * WH * fp32 if stride != 1 else 0)
    live_bytes = 4 * (TH + 2) * WH * fp32
    need = 2 * blk_bytes + 2 * wt_bytes + scr_bytes + live_bytes
    vmem_limit = int(min(max(3 * need, 16 * 2 ** 20), 48 * 2 ** 20))

    out = pl.pallas_call(
        kernel,
        out_shape=jax.ShapeDtypeStruct((N, Ho, WO), x_nhwc.dtype),
        grid_spec=pltpu.PrefetchScalarGridSpec(
            num_scalar_prefetch=0,
            grid=(N, nblk),
            in_specs=[
                main_spec,                    # main TH rows
                top_spec,                     # 8-row block holding top halo
                bot_spec,                     # 8-row block holding bottom halo
                const_spec(w1big), const_spec(b1),     # stage A (scale folded)
                const_spec(wdwbig), const_spec(b2),    # stage B (scale folded)
                const_spec(w3big), const_spec(b3),     # stage C (scale folded)
            ],
            out_specs=pl.BlockSpec((1, THo, WO), lambda n, r: (n, r, 0)),
            scratch_shapes=scratch,
        ),
        compiler_params=pltpu.CompilerParams(
            dimension_semantics=("parallel", "parallel"),
            vmem_limit_bytes=vmem_limit),
    )(x_flat, x_flat, x_flat, w1big, b1, wdwbig, b2, w3big, b3)

    return out.reshape(N, Ho, Wo, Oup)


# ---------------------------------------------------------------------------
# Deterministic parameter construction (PyTorch weight layouts)
# ---------------------------------------------------------------------------
def init_params(key, inp, oup, expand_ratio):
    Hid = inp * expand_ratio
    G3 = int(round(oup / 2))
    ks = jax.random.split(key, 6)

    w1 = 0.3 * jax.random.normal(ks[0], (Hid, inp // 2), jnp.float32)   # Conv1 (groups=2)
    wdw = 0.3 * jax.random.normal(ks[1], (Hid, 3, 3), jnp.float32)      # depthwise 3x3
    w3 = 0.3 * jax.random.normal(ks[2], (oup, Hid // 2), jnp.float32)   # Conv3 (groups=2)

    def bn_params(k, c):
        k1, k2, k3, k4 = jax.random.split(k, 4)
        gamma = 1.0 + 0.1 * jax.random.normal(k1, (c,), jnp.float32)
        beta = 0.1 * jax.random.normal(k2, (c,), jnp.float32)
        mean = 0.1 * jax.random.normal(k3, (c,), jnp.float32)
        var = 0.5 + jax.random.uniform(k4, (c,), jnp.float32)
        return gamma, beta, mean, var

    return dict(w1=w1, wdw=wdw, w3=w3,
                bn1=bn_params(ks[3], Hid),
                bn2=bn_params(ks[4], Hid),
                bn3=bn_params(ks[5], oup),
                Hid=Hid, G3=G3)


def fold_params(raw, inp, oup, W, stride):
    """Fold grouped convs, BN affines, channel shuffles and lane packing."""
    Hid, G3 = raw['Hid'], raw['G3']
    assert inp % 2 == 0 and Hid % 2 == 0 and oup % 2 == 0 and oup % G3 == 0
    Wo = (W - 1) // stride + 1

    def bn_affine(bn):
        gamma, beta, mean, var = bn
        s = gamma / jnp.sqrt(var + EPS)
        return s, beta - mean * s

    # Stage A: block-diagonal (inp, Hid); fold shuffle(groups=2) + BN1 scale.
    W1 = jnp.zeros((inp, Hid), jnp.float32)
    for g in range(2):
        W1 = W1.at[g * (inp // 2):(g + 1) * (inp // 2),
                   g * (Hid // 2):(g + 1) * (Hid // 2)].set(
            raw['w1'][g * (Hid // 2):(g + 1) * (Hid // 2), :].T)
    s1, b1 = bn_affine(raw['bn1'])
    p1 = jnp.array([(j % 2) * (Hid // 2) + j // 2 for j in range(Hid)])
    W1e = W1[:, p1] * s1[p1][None, :]
    b1e = b1[p1]

    # Stage B: depthwise weights in post-shuffle order, BN2 scale folded.
    s2, b2 = bn_affine(raw['bn2'])
    wdw = jnp.transpose(raw['wdw'], (1, 2, 0)).reshape(9, Hid) * s2[None, :]

    # Stage C: block-diagonal (Hid, oup); fold shuffle(groups=G3) + BN3 scale.
    W3 = jnp.zeros((Hid, oup), jnp.float32)
    for g in range(2):
        W3 = W3.at[g * (Hid // 2):(g + 1) * (Hid // 2),
                   g * (oup // 2):(g + 1) * (oup // 2)].set(
            raw['w3'][g * (oup // 2):(g + 1) * (oup // 2), :].T)
    s3, b3 = bn_affine(raw['bn3'])
    p3 = jnp.array([(j % G3) * (oup // G3) + j // G3 for j in range(oup)])
    W3e = W3[:, p3] * s3[p3][None, :]
    b3e = b3[p3]

    # ---- lane packing: per-pixel 1x1 convs -> kron matmuls, bf16 weights ----
    # TODO(synk): band/tile these O(W^2) kron weights for large W (v7x VMEM).
    W1big = jnp.kron(jnp.eye(W, dtype=jnp.float32), W1e).astype(jnp.bfloat16)

    wdwbig = jnp.tile(wdw, (1, W))                           # (9, W*Hid) f32
    # Fold the horizontal image-border masks into the weights:
    wdwbig = wdwbig.at[0::3, :Hid].set(0.0)                  # left tap, x == 0
    wdwbig = wdwbig.at[2::3, (W - 1) * Hid:].set(0.0)        # right tap, x == W-1

    # Stage C kron weight, W-subsampling for stride>1 folded in.
    W3big = jnp.zeros((W * Hid, Wo * oup), jnp.float32)
    for j in range(Wo):
        xin = j * stride
        W3big = W3big.at[xin * Hid:(xin + 1) * Hid,
                         j * oup:(j + 1) * oup].set(W3e)
    W3big = W3big.astype(jnp.bfloat16)

    def row(v, reps):
        return jnp.tile(v.reshape(1, -1), (1, reps))

    return (W1big, row(b1e, W), wdwbig, row(b2, W), W3big, row(b3e, Wo))


# ---------------------------------------------------------------------------
# Pure-JAX reference (NCHW, mirrors the PyTorch module, eval-mode BN)
# ---------------------------------------------------------------------------
def inverted_residual_ref(x_nchw, raw, stride, use_res):
    Hid, G3 = raw['Hid'], raw['G3']

    def conv(x, w, stride=1, pad=0, groups=1):
        return jax.lax.conv_general_dilated(
            x, w, (stride, stride), [(pad, pad), (pad, pad)],
            dimension_numbers=('NCHW', 'OIHW', 'NCHW'),
            feature_group_count=groups,
            precision=jax.lax.Precision.HIGHEST)

    def bn(x, p):
        gamma, beta, mean, var = p
        s = gamma / jnp.sqrt(var + EPS)
        return x * s[None, :, None, None] + (beta - mean * s)[None, :, None, None]

    def relu6(x):
        return jnp.clip(x, 0.0, 6.0)

    def shuffle(x, G):
        n, c, h, w = x.shape
        return x.reshape(n, G, c // G, h, w).transpose(0, 2, 1, 3, 4).reshape(n, c, h, w)

    w1 = raw['w1'][:, :, None, None]
    wdw = raw['wdw'][:, None, :, :]
    w3 = raw['w3'][:, :, None, None]

    h = relu6(bn(conv(x_nchw, w1, groups=2), raw['bn1']))
    h = shuffle(h, 2)
    h = relu6(bn(conv(h, wdw, stride=stride, pad=1, groups=Hid), raw['bn2']))
    h = bn(conv(h, w3, groups=2), raw['bn3'])
    h = shuffle(h, G3)
    if use_res:
        h = h + x_nchw
    return h


# ---------------------------------------------------------------------------
if __name__ == "__main__":
    N, inp, oup, stride, expand_ratio, H, W = 2, 8, 8, 1, 4, 16, 16
    use_res = (stride == 1 and inp == oup)

    key = jax.random.PRNGKey(0)
    kx, kp = jax.random.split(key)
    x_nchw = jax.random.normal(kx, (N, inp, H, W), jnp.float32)

    raw = init_params(kp, inp, oup, expand_ratio)
    params = fold_params(raw, inp, oup, W, stride)

    x_nhwc = jnp.transpose(x_nchw, (0, 2, 3, 1))
    # row_block=8 -> two row blocks per image: exercises the cross-block halo.
    out_nhwc = inverted_residual_pallas(x_nhwc, params, stride, use_res,
                                        row_block=8)
    out_nhwc = jax.block_until_ready(out_nhwc)
    out_nchw = jnp.transpose(out_nhwc, (0, 3, 1, 2))

    ref = inverted_residual_ref(x_nchw, raw, stride, use_res)
    err = float(jnp.max(jnp.abs(out_nchw - ref)))
    # bf16 MXU operands (f32 accumulation, BN scales folded pre-cast) -> loose
    # tolerance relative to the f32 HIGHEST-precision reference.
    assert jnp.allclose(out_nchw, ref, rtol=5e-2, atol=1e-1), f"max abs err={err}"
    print("KERNEL_OK")
</pallas_src>

<mosaic_0001>
module attributes {stable_mosaic.version = 11 : i64} {
  func.func @kernel(%arg0: i32, %arg1: i32, %arg2: memref<1x8x128xf32, #tpu.memory_space<vmem>>, %arg3: memref<1x8x128xf32, #tpu.memory_space<vmem>>, %arg4: memref<1x8x128xf32, #tpu.memory_space<vmem>>, %arg5: memref<128x512xbf16, #tpu.memory_space<vmem>>, %arg6: memref<1x512xf32, #tpu.memory_space<vmem>>, %arg7: memref<9x512xf32, #tpu.memory_space<vmem>>, %arg8: memref<1x512xf32, #tpu.memory_space<vmem>>, %arg9: memref<512x128xbf16, #tpu.memory_space<vmem>>, %arg10: memref<1x128xf32, #tpu.memory_space<vmem>>, %arg11: memref<1x8x128xf32, #tpu.memory_space<vmem>>, %arg12: memref<10x128xf32, #tpu.memory_space<vmem>>) attributes {dimension_semantics = [#tpu.dimension_semantics<parallel>, #tpu.dimension_semantics<parallel>], iteration_bounds = array<i64: 2, 2>, scalar_prefetch = 0 : i64, scratch_operands = 1 : i64, tpu.core_type = #tpu.core_type<tc>, window_params = [{transform_indices = @transform_0, window_bounds = array<i64: 1, 8, 128>}, {transform_indices = @transform_1, window_bounds = array<i64: 1, 8, 128>}, {transform_indices = @transform_2, window_bounds = array<i64: 1, 8, 128>}, {pipeline_mode = #tpu.pipeline_mode<synchronous>, transform_indices = @transform_3, window_bounds = array<i64: 128, 512>}, {pipeline_mode = #tpu.pipeline_mode<synchronous>, transform_indices = @transform_4, window_bounds = array<i64: 1, 512>}, {pipeline_mode = #tpu.pipeline_mode<synchronous>, transform_indices = @transform_5, window_bounds = array<i64: 9, 512>}, {pipeline_mode = #tpu.pipeline_mode<synchronous>, transform_indices = @transform_6, window_bounds = array<i64: 1, 512>}, {pipeline_mode = #tpu.pipeline_mode<synchronous>, transform_indices = @transform_7, window_bounds = array<i64: 512, 128>}, {pipeline_mode = #tpu.pipeline_mode<synchronous>, transform_indices = @transform_8, window_bounds = array<i64: 1, 128>}, {transform_indices = @transform_9, window_bounds = array<i64: 1, 8, 128>}]} {
    %c0 = arith.constant 0 : index
    %c7 = arith.constant 7 : index
    %c0_0 = arith.constant 0 : index
    %0 = vector.load %arg3[%c0, %c7, %c0_0] : memref<1x8x128xf32, #tpu.memory_space<vmem>>, vector<1x1x128xf32>
    %1 = vector.shape_cast %0 : vector<1x1x128xf32> to vector<1x128xf32>
    %c0_1 = arith.constant 0 : index
    %c0_2 = arith.constant 0 : index
    %2 = vector.load %arg12[%c0_1, %c0_2] : memref<10x128xf32, #tpu.memory_space<vmem>>, vector<1x128xf32>
    tpu.vector_store %arg12[%c0_1, %c0_2], %1 {strides = array<i32>} : memref<10x128xf32, #tpu.memory_space<vmem>>, vector<1x128xf32>,
    %c0_3 = arith.constant 0 : index
    %c0_4 = arith.constant 0 : index
    %c0_5 = arith.constant 0 : index
    %3 = vector.load %arg2[%c0_3, %c0_4, %c0_5] : memref<1x8x128xf32, #tpu.memory_space<vmem>>, vector<1x8x128xf32>
    %4 = vector.shape_cast %3 : vector<1x8x128xf32> to vector<8x128xf32>
    %c1 = arith.constant 1 : index
    %c0_6 = arith.constant 0 : index
    %5 = vector.load %arg12[%c1, %c0_6] : memref<10x128xf32, #tpu.memory_space<vmem>>, vector<8x128xf32>
    tpu.vector_store %arg12[%c1, %c0_6], %4 {strides = array<i32>} : memref<10x128xf32, #tpu.memory_space<vmem>>, vector<8x128xf32>,
    %c0_7 = arith.constant 0 : index
    %c0_8 = arith.constant 0 : index
    %c0_9 = arith.constant 0 : index
    %6 = vector.load %arg4[%c0_7, %c0_8, %c0_9] : memref<1x8x128xf32, #tpu.memory_space<vmem>>, vector<1x1x128xf32>
    %7 = vector.shape_cast %6 : vector<1x1x128xf32> to vector<1x128xf32>
    %c9 = arith.constant 9 : index
    %c0_10 = arith.constant 0 : index
    %8 = vector.load %arg12[%c9, %c0_10] : memref<10x128xf32, #tpu.memory_space<vmem>>, vector<1x128xf32>
    tpu.vector_store %arg12[%c9, %c0_10], %7 {strides = array<i32>} : memref<10x128xf32, #tpu.memory_space<vmem>>, vector<1x128xf32>,
    %c0_11 = arith.constant 0 : index
    %c0_12 = arith.constant 0 : index
    %9 = vector.load %arg12[%c0_11, %c0_12] : memref<10x128xf32, #tpu.memory_space<vmem>>, vector<10x128xf32>
    %10 = arith.truncf %9 : vector<10x128xf32> to vector<10x128xbf16>
    %c0_13 = arith.constant 0 : index
    %c0_14 = arith.constant 0 : index
    %11 = vector.load %arg5[%c0_13, %c0_14] : memref<128x512xbf16, #tpu.memory_space<vmem>>, vector<128x512xbf16>
    %cst = arith.constant dense<0.000000e+00> : vector<10x512xf32>
    %12 = tpu.matmul %10, %11, %cst {dimension_numbers = #tpu.dot_dimension_numbers<[1], [0], [0], [1], [0, 0, 1, 1], [], []>} : vector<10x128xbf16>, vector<128x512xbf16>, vector<10x512xf32> -> vector<10x512xf32>
    %c0_15 = arith.constant 0 : index
    %c0_16 = arith.constant 0 : index
    %13 = vector.load %arg6[%c0_15, %c0_16] : memref<1x512xf32, #tpu.memory_space<vmem>>, vector<1x512xf32>
    %14 = vector.broadcast %13 : vector<1x512xf32> to vector<10x512xf32>
    %15 = arith.addf %12, %14 : vector<10x512xf32>
    %cst_17 = arith.constant 0.000000e+00 : f32
    %cst_18 = arith.constant 6.000000e+00 : f32
    %16 = vector.broadcast %cst_17 : f32 to vector<10x512xf32>
    %17 = arith.maximumf %16, %15 : vector<10x512xf32>
    %18 = vector.broadcast %cst_18 : f32 to vector<10x512xf32>
    %19 = arith.minimumf %18, %17 : vector<10x512xf32>
    %20 = tpu.iota {dimensions = array<i32: 0>} : vector<10x1xi32>
    %c0_i32 = arith.constant 0 : i32
    %21 = arith.cmpi eq, %arg1, %c0_i32 : i32
    %c0_i32_19 = arith.constant 0 : i32
    %22 = vector.broadcast %c0_i32_19 : i32 to vector<10x1xi32>
    %23 = arith.cmpi eq, %20, %22 : vector<10x1xi32>
    %24 = vector.broadcast %21 : i1 to vector<10x1xi1>
    %25 = arith.andi %24, %23 : vector<10x1xi1>
    %c1_i32 = arith.constant 1 : i32
    %26 = arith.cmpi eq, %arg1, %c1_i32 : i32
    %c9_i32 = arith.constant 9 : i32
    %27 = vector.broadcast %c9_i32 : i32 to vector<10x1xi32>
    %28 = arith.cmpi eq, %20, %27 : vector<10x1xi32>
    %29 = vector.broadcast %26 : i1 to vector<10x1xi1>
    %30 = arith.andi %29, %28 : vector<10x1xi1>
    %31 = arith.ori %25, %30 : vector<10x1xi1>
    %cst_20 = arith.constant 0.000000e+00 : f32
    %32 = vector.shape_cast %31 : vector<10x1xi1> to vector<10x1xi1>
    %33 = vector.broadcast %32 : vector<10x1xi1> to vector<10x512xi1>
    %34 = vector.broadcast %cst_20 : f32 to vector<10x512xf32>
    %35 = arith.select %33, %34, %19 : vector<10x512xi1>, vector<10x512xf32>
    %cst_21 = arith.constant 0.000000e+00 : f32
    %36 = vector.broadcast %cst_21 : f32 to vector<8x512xf32>
    %c32_i32 = arith.constant 32 : i32
    %37 = tpu.dynamic_rotate %35 by %c32_i32 dim 1 : vector<10x512xf32>, i32 -> vector<10x512xf32>
    %c480_i32 = arith.constant 480 : i32
    %38 = tpu.dynamic_rotate %35 by %c480_i32 dim 1 : vector<10x512xf32>, i32 -> vector<10x512xf32>
    %39 = vector.extract_strided_slice %37 {offsets = [0, 0], sizes = [8, 512], strides = [1, 1]} : vector<10x512xf32> to vector<8x512xf32>
    %c0_22 = arith.constant 0 : index
    %c0_23 = arith.constant 0 : index
    %40 = vector.load %arg7[%c0_22, %c0_23] : memref<9x512xf32, #tpu.memory_space<vmem>>, vector<1x512xf32>
    %41 = vector.broadcast %40 : vector<1x512xf32> to vector<8x512xf32>
    %42 = arith.mulf %39, %41 : vector<8x512xf32>
    %43 = arith.addf %36, %42 : vector<8x512xf32>
    %44 = vector.extract_strided_slice %35 {offsets = [0, 0], sizes = [8, 512], strides = [1, 1]} : vector<10x512xf32> to vector<8x512xf32>
    %c1_24 = arith.constant 1 : index
    %c0_25 = arith.constant 0 : index
    %45 = vector.load %arg7[%c1_24, %c0_25] : memref<9x512xf32, #tpu.memory_space<vmem>>, vector<1x512xf32>
    %46 = vector.broadcast %45 : vector<1x512xf32> to vector<8x512xf32>
    %47 = arith.mulf %44, %46 : vector<8x512xf32>
    %48 = arith.addf %43, %47 : vector<8x512xf32>
    %49 = vector.extract_strided_slice %38 {offsets = [0, 0], sizes = [8, 512], strides = [1, 1]} : vector<10x512xf32> to vector<8x512xf32>
    %c2 = arith.constant 2 : index
    %c0_26 = arith.constant 0 : index
    %50 = vector.load %arg7[%c2, %c0_26] : memref<9x512xf32, #tpu.memory_space<vmem>>, vector<1x512xf32>
    %51 = vector.broadcast %50 : vector<1x512xf32> to vector<8x512xf32>
    %52 = arith.mulf %49, %51 : vector<8x512xf32>
    %53 = arith.addf %48, %52 : vector<8x512xf32>
    %54 = vector.extract_strided_slice %37 {offsets = [1, 0], sizes = [8, 512], strides = [1, 1]} : vector<10x512xf32> to vector<8x512xf32>
    %c3 = arith.constant 3 : index
    %c0_27 = arith.constant 0 : index
    %55 = vector.load %arg7[%c3, %c0_27] : memref<9x512xf32, #tpu.memory_space<vmem>>, vector<1x512xf32>
    %56 = vector.broadcast %55 : vector<1x512xf32> to vector<8x512xf32>
    %57 = arith.mulf %54, %56 : vector<8x512xf32>
    %58 = arith.addf %53, %57 : vector<8x512xf32>
    %59 = vector.extract_strided_slice %35 {offsets = [1, 0], sizes = [8, 512], strides = [1, 1]} : vector<10x512xf32> to vector<8x512xf32>
    %c4 = arith.constant 4 : index
    %c0_28 = arith.constant 0 : index
    %60 = vector.load %arg7[%c4, %c0_28] : memref<9x512xf32, #tpu.memory_space<vmem>>, vector<1x512xf32>
    %61 = vector.broadcast %60 : vector<1x512xf32> to vector<8x512xf32>
    %62 = arith.mulf %59, %61 : vector<8x512xf32>
    %63 = arith.addf %58, %62 : vector<8x512xf32>
    %64 = vector.extract_strided_slice %38 {offsets = [1, 0], sizes = [8, 512], strides = [1, 1]} : vector<10x512xf32> to vector<8x512xf32>
    %c5 = arith.constant 5 : index
    %c0_29 = arith.constant 0 : index
    %65 = vector.load %arg7[%c5, %c0_29] : memref<9x512xf32, #tpu.memory_space<vmem>>, vector<1x512xf32>
    %66 = vector.broadcast %65 : vector<1x512xf32> to vector<8x512xf32>
    %67 = arith.mulf %64, %66 : vector<8x512xf32>
    %68 = arith.addf %63, %67 : vector<8x512xf32>
    %69 = vector.extract_strided_slice %37 {offsets = [2, 0], sizes = [8, 512], strides = [1, 1]} : vector<10x512xf32> to vector<8x512xf32>
    %c6 = arith.constant 6 : index
    %c0_30 = arith.constant 0 : index
    %70 = vector.load %arg7[%c6, %c0_30] : memref<9x512xf32, #tpu.memory_space<vmem>>, vector<1x512xf32>
    %71 = vector.broadcast %70 : vector<1x512xf32> to vector<8x512xf32>
    %72 = arith.mulf %69, %71 : vector<8x512xf32>
    %73 = arith.addf %68, %72 : vector<8x512xf32>
    %74 = vector.extract_strided_slice %35 {offsets = [2, 0], sizes = [8, 512], strides = [1, 1]} : vector<10x512xf32> to vector<8x512xf32>
    %c7_31 = arith.constant 7 : index
    %c0_32 = arith.constant 0 : index
    %75 = vector.load %arg7[%c7_31, %c0_32] : memref<9x512xf32, #tpu.memory_space<vmem>>, vector<1x512xf32>
    %76 = vector.broadcast %75 : vector<1x512xf32> to vector<8x512xf32>
    %77 = arith.mulf %74, %76 : vector<8x512xf32>
    %78 = arith.addf %73, %77 : vector<8x512xf32>
    %79 = vector.extract_strided_slice %38 {offsets = [2, 0], sizes = [8, 512], strides = [1, 1]} : vector<10x512xf32> to vector<8x512xf32>
    %c8 = arith.constant 8 : index
    %c0_33 = arith.constant 0 : index
    %80 = vector.load %arg7[%c8, %c0_33] : memref<9x512xf32, #tpu.memory_space<vmem>>, vector<1x512xf32>
    %81 = vector.broadcast %80 : vector<1x512xf32> to vector<8x512xf32>
    %82 = arith.mulf %79, %81 : vector<8x512xf32>
    %83 = arith.addf %78, %82 : vector<8x512xf32>
    %c0_34 = arith.constant 0 : index
    %c0_35 = arith.constant 0 : index
    %84 = vector.load %arg8[%c0_34, %c0_35] : memref<1x512xf32, #tpu.memory_space<vmem>>, vector<1x512xf32>
    %85 = vector.broadcast %84 : vector<1x512xf32> to vector<8x512xf32>
    %86 = arith.addf %83, %85 : vector<8x512xf32>
    %cst_36 = arith.constant 0.000000e+00 : f32
    %cst_37 = arith.constant 6.000000e+00 : f32
    %87 = vector.broadcast %cst_36 : f32 to vector<8x512xf32>
    %88 = arith.maximumf %87, %86 : vector<8x512xf32>
    %89 = vector.broadcast %cst_37 : f32 to vector<8x512xf32>
    %90 = arith.minimumf %89, %88 : vector<8x512xf32>
    %91 = arith.truncf %90 : vector<8x512xf32> to vector<8x512xbf16>
    %c0_38 = arith.constant 0 : index
    %c0_39 = arith.constant 0 : index
    %92 = vector.load %arg9[%c0_38, %c0_39] : memref<512x128xbf16, #tpu.memory_space<vmem>>, vector<512x128xbf16>
    %cst_40 = arith.constant dense<0.000000e+00> : vector<8x128xf32>
    %93 = tpu.matmul %91, %92, %cst_40 {dimension_numbers = #tpu.dot_dimension_numbers<[1], [0], [0], [1], [0, 0, 1, 1], [], []>} : vector<8x512xbf16>, vector<512x128xbf16>, vector<8x128xf32> -> vector<8x128xf32>
    %c0_41 = arith.constant 0 : index
    %c0_42 = arith.constant 0 : index
    %94 = vector.load %arg10[%c0_41, %c0_42] : memref<1x128xf32, #tpu.memory_space<vmem>>, vector<1x128xf32>
    %95 = vector.broadcast %94 : vector<1x128xf32> to vector<8x128xf32>
    %96 = arith.addf %93, %95 : vector<8x128xf32>
    %c0_43 = arith.constant 0 : index
    %c0_44 = arith.constant 0 : index
    %c0_45 = arith.constant 0 : index
    %97 = vector.load %arg2[%c0_43, %c0_44, %c0_45] : memref<1x8x128xf32, #tpu.memory_space<vmem>>, vector<1x8x128xf32>
    %98 = vector.shape_cast %97 : vector<1x8x128xf32> to vector<8x128xf32>
    %99 = arith.addf %96, %98 : vector<8x128xf32>
    %c0_46 = arith.constant 0 : index
    %c0_47 = arith.constant 0 : index
    %c0_48 = arith.constant 0 : index
    %100 = vector.load %arg11[%c0_46, %c0_47, %c0_48] : memref<1x8x128xf32, #tpu.memory_space<vmem>>, vector<1x8x128xf32>
    %101 = vector.shape_cast %100 : vector<1x8x128xf32> to vector<8x128xf32>
    %102 = vector.shape_cast %99 : vector<8x128xf32> to vector<1x8x128xf32>
    tpu.vector_store %arg11[%c0_46, %c0_47, %c0_48], %102 {strides = array<i32>} : memref<1x8x128xf32, #tpu.memory_space<vmem>>, vector<1x8x128xf32>,
    return
  }
  func.func @transform_0(%arg0: i32, %arg1: i32) -> (i32, i32, i32) {
    %c0_i32 = arith.constant 0 : i32
    %c0_i32_0 = arith.constant 0 : i32
    return %arg0, %arg1, %c0_i32 : i32, i32, i32
  }
  func.func @transform_1(%arg0: i32, %arg1: i32) -> (i32, i32, i32) {
    %c1_i32 = arith.constant 1 : i32
    %0 = arith.muli %arg1, %c1_i32 : i32
    %c1_i32_0 = arith.constant 1 : i32
    %1 = arith.subi %0, %c1_i32_0 : i32
    %c0_i32 = arith.constant 0 : i32
    %2 = arith.maxsi %1, %c0_i32 : i32
    %c0_i32_1 = arith.constant 0 : i32
    %c0_i32_2 = arith.constant 0 : i32
    return %arg0, %2, %c0_i32_1 : i32, i32, i32
  }
  func.func @transform_2(%arg0: i32, %arg1: i32) -> (i32, i32, i32) {
    %c1_i32 = arith.constant 1 : i32
    %0 = arith.muli %arg1, %c1_i32 : i32
    %c1_i32_0 = arith.constant 1 : i32
    %1 = arith.addi %0, %c1_i32_0 : i32
    %c1_i32_1 = arith.constant 1 : i32
    %2 = arith.minsi %1, %c1_i32_1 : i32
    %c0_i32 = arith.constant 0 : i32
    %c0_i32_2 = arith.constant 0 : i32
    return %arg0, %2, %c0_i32 : i32, i32, i32
  }
  func.func @transform_3(%arg0: i32, %arg1: i32) -> (i32, i32) {
    %c0_i32 = arith.constant 0 : i32
    %c0_i32_0 = arith.constant 0 : i32
    %c0_i32_1 = arith.constant 0 : i32
    return %c0_i32, %c0_i32_0 : i32, i32
  }
  func.func @transform_4(%arg0: i32, %arg1: i32) -> (i32, i32) {
    %c0_i32 = arith.constant 0 : i32
    %c0_i32_0 = arith.constant 0 : i32
    %c0_i32_1 = arith.constant 0 : i32
    return %c0_i32, %c0_i32_0 : i32, i32
  }
  func.func @transform_5(%arg0: i32, %arg1: i32) -> (i32, i32) {
    %c0_i32 = arith.constant 0 : i32
    %c0_i32_0 = arith.constant 0 : i32
    %c0_i32_1 = arith.constant 0 : i32
    return %c0_i32, %c0_i32_0 : i32, i32
  }
  func.func @transform_6(%arg0: i32, %arg1: i32) -> (i32, i32) {
    %c0_i32 = arith.constant 0 : i32
    %c0_i32_0 = arith.constant 0 : i32
    %c0_i32_1 = arith.constant 0 : i32
    return %c0_i32, %c0_i32_0 : i32, i32
  }
  func.func @transform_7(%arg0: i32, %arg1: i32) -> (i32, i32) {
    %c0_i32 = arith.constant 0 : i32
    %c0_i32_0 = arith.constant 0 : i32
    %c0_i32_1 = arith.constant 0 : i32
    return %c0_i32, %c0_i32_0 : i32, i32
  }
  func.func @transform_8(%arg0: i32, %arg1: i32) -> (i32, i32) {
    %c0_i32 = arith.constant 0 : i32
    %c0_i32_0 = arith.constant 0 : i32
    %c0_i32_1 = arith.constant 0 : i32
    return %c0_i32, %c0_i32_0 : i32, i32
  }
  func.func @transform_9(%arg0: i32, %arg1: i32) -> (i32, i32, i32) {
    %c0_i32 = arith.constant 0 : i32
    %c0_i32_0 = arith.constant 0 : i32
    return %arg0, %arg1, %c0_i32 : i32, i32, i32
  }
}

</mosaic_0001>

<bundles_post_ra>
// kernel: tpu_custom_call.1
= control target key start
LH: loop header
LB: loop body
LE: loop exit
PB: predicated region body
PF: predicated region fallthrough
CT: control target
= control target key end

     0   :  { %s3638_s0 = inlined_call_operand.hbm [shape: f32[2,16,128], index: 0, kind: input, shape index: {}]   ;;  %s3639_s1 = inlined_call_operand.hbm [shape: f32[2,16,128], index: 1, kind: input, shape index: {}]   ;;  %s3640_s2 = inlined_call_operand.hbm [shape: f32[2,16,128], index: 2, kind: input, shape index: {}]   ;;  %s3641_s3 = inlined_call_operand.hbm [shape: bf16[128,512], index: 3, kind: input, shape index: {}]   ;;  %s3642_s4 = inlined_call_operand.vmem [shape: f32[1,512], index: 4, kind: input, shape index: {}]   ;;  %s3643_s5 = inlined_call_operand.hbm [shape: f32[9,512], index: 5, kind: input, shape index: {}]   ;;  %s3644_s6 = inlined_call_operand.vmem [shape: f32[1,512], index: 6, kind: input, shape index: {}]   ;;  %s3645_s7 = inlined_call_operand.hbm [shape: bf16[512,128], index: 7, kind: input, shape index: {}]   ;;  %s3646_s8 = inlined_call_operand.vmem [shape: f32[1,128], index: 8, kind: input, shape index: {}]   ;;  %s3647_s9 = inlined_call_operand.hbm [shape: f32[2,16,128], index: 9, kind: output, shape index: {}]  }
   0x1   :  { %3676 = sst [smem:[#allocation39_spill]] %s3639_s1 }
   0x2   :  { %3677 = sst [smem:[#allocation40_spill]] %s3640_s2 }
   0x3   :  { %3678 = sst [smem:[#allocation41_spill]] %s3641_s3 }
   0x4   :  { %3679 = sst [smem:[#allocation42_spill]] %s3642_s4 }
   0x5   :  { %3680 = sst [smem:[#allocation43_spill]] %s3644_s6 }
   0x6   :  { %3681 = sst [smem:[#allocation44_spill]] %s3646_s8 }
   0x7   :  { %3682 = sst [smem:[#allocation45_spill]] %s3647_s9 }
   0x8   :  { %14 = vsyncpa [#allocation4], 0 }
   0x9   :  { %16 = vsyncpa [#allocation4 + $0x1], 0 }
   0xa   :  { %17 = vsyncpa [#allocation7], 0 }
   0xb   :  { %19 = vsyncpa [#allocation7 + $0x1], 0 }
   0xc   :  { %20 = vsyncpa [#allocation10], 0 }
   0xd   :  { %21 = vsyncpa [#allocation13], 0 }
   0xe   :  { %22 = vsyncpa [#allocation5], 0 }
   0xf   :  { %24 = vsyncpa [#allocation5 + $0x1], 0  ;;  %s2739_s30 = smov 0   ;;  %s2741_s10 = smov 0  }
  0x10   :  { %s2743_s11 = smov 0   ;;  %s2745_s12 = smov 0  }
  0x11   :  { %s2747_s13 = smov 0   ;;  %s2749_s14 = smov 0  }
  0x12   :  { %s2751_s15 = smov 0   ;;  %s2753_s16 = smov 0  }
  0x13   :  { %s2755_s17 = smov 0   ;;  %s2757_s18 = smov 0  }
  0x14   :  { %s2759_s19 = smov 0   ;;  %s2761_s20 = smov 0  }
  0x15   :  { %s2763_s21 = smov 0   ;;  %s2765_s22 = smov 0  }
  0x16 LB: > { %3683 = sst [smem:[#allocation21_spill]] %s2635_s13  ;;  %s2810_s23 = sadd.s32 4294967295, %s2671_s22   ;;  %s2671_s22 = sphi %s2765_s22, %s30_s22   ;;  %s2667_s21 = sphi %s2763_s21, %s3787_s21   ;;  %s2663_s20 = sphi %s2761_s20, %s3786_s20   ;;  %s2659_s19 = sphi %s2759_s19, %s3785_s19   ;;  %s2655_s18 = sphi %s2757_s18, %s3784_s18   ;;  %s2651_s17 = sphi %s2755_s17, %s3783_s17   ;;  %s2647_s16 = sphi %s2753_s16, %s3782_s16   ;;  %s2643_s15 = sphi %s2751_s15, %s3781_s15   ;;  %s2639_s14 = sphi %s2749_s14, %s3774_s14   ;;  %s2635_s13 = sphi %s2747_s13, %s3773_s13   ;;  %s2631_s12 = sphi %s2745_s12, %s3780_s12   ;;  %s2627_s11 = sphi %s2743_s11, %s3779_s11   ;;  %s2623_s10 = sphi %s2741_s10, %s3778_s10   ;;  %s2619_s30 = sphi %s2739_s30, %s3777_s30  }
  0x17   : > { %3684 = sst [smem:[#allocation22_spill]] %s2639_s14  ;;  %p1937_p0 = scmp.ge.s32.totalorder %s2671_s22, 1 }
  0x18   : > { %3685 = sst [smem:[#allocation23_spill]] %s2655_s18  ;;  %p3649_p1 = scmp.eq.s32.totalorder %s2810_s23, 0 }
  0x19   : > { %3686 = sst [smem:[#allocation24_spill]] %s2659_s19  ;;  %p297_p2 = scmp.lt.s32.totalorder %s2671_s22, 5 }
  0x1a   : > { %s2673_s25 = smov [#allocation9]   ;;  %s3690_s3 = sld [smem:[#allocation41_spill]] }
  0x1b   : > { %p2815_p3 = pnand %p1937_p0, %p297_p2  ;;  %s309_s26 = sshll.u32 %s2673_s25, 4  ;;  %s310_s26 = int_to_ptr.vmem [resolvable:$true] %s309_s26 }
  0x1d   : > { %s3687_s24 = scalar_select %p2815_p3, 1, 0 }
  0x1e   : > { %p2094_p4 = pneg %p2815_p3 }
  0x1f   : > { %3688 = sst [smem:[#allocation25_spill]] %s3687_s24 }
  0x20   : > { %p2823_p5 = pnand %p2094_p4, %p3649_p1  ;;  %s2331_s9 = scalar_lea.hbm %s3690_s3, 4096 }
  0x21   : > { %p2332_p6 = scmp.ne.s32.totalorder %s3690_s3, %s2331_s9  ;;  %p2338_p10 = scmp.lt.u32.totalorder %s2331_s9, %s3690_s3 }
  0x22   : > { %s3689_s27 = scalar_select %p2823_p5, 1, 0 }
  0x23   : > { %p2835_p7 = pneg %p2823_p5 }
  0x25   : > { %p2334_p8 = pnand %p2835_p7, %p2332_p6 }
  0x27   : > { %p2335_p9 = pneg %p2334_p8 }
  0x29   : > { %p2340_p11 = pnand %p2338_p10, %p2335_p9 }
  0x2b   : > { %2343 = shalt.err (!%p2340_p11)
}
  0x2c   : > { %s2344_s28 = scalar_lea.vmem %s310_s26, 4096  ;;  %p2352_p2 = scmp.lt.s32.totalorder %s310_s26, %s310_s26 }
  0x2d   : > { %p2345_p12 = scmp.ne.s32.totalorder %s310_s26, %s2344_s28  ;;  %p2353_p4 = scmp.lt.s32.totalorder %s2344_s28, %s2344_s28 }
  0x2f   : > { %p2347_p13 = pnand %p2345_p12, %p2835_p7  ;;  %p2354_p1 = por %p2353_p4, %p2352_p2 }
  0x31   : > { %p2348_p0 = pneg %p2347_p13 }
  0x33   : > { %p2355_p3 = pnand %p2354_p1, %p2348_p0 }
  0x35   : > { %2358 = shalt.err (!%p2355_p3)
}
  0x36   : > { %s2674_s8 = smov 256   ;;  %s2675_s4 = smov 16  }
  0x37   : > { %2097 = dma.hbm_to_vmem [thread:$0]  (!%p2823_p5), %s3690_s3, 4096, %s310_s26, [#allocation10], %s2674_s8, %s2674_s8, %s2675_s4  }
  0x38   : > { %s39_s19 = sadd.s32 1, %s2663_s20  ;;  %s42_s29 = sadd.s32 1, %s2667_s21 }
  0x39   : > { %p40_p1 = scmp.ge.s32.totalorder %s39_s19, 2  ;;  %p3663_p3 = scmp.eq.s32.totalorder %s2671_s22, 0 }
  0x3a   : > { %s85_s26 = sadd.s32 1, %s2639_s14  ;;  %p92_p8 = scmp.ne.s32.totalorder %s2639_s14, %s2635_s13 }
  0x3b   : > { %s3789_s19 = smov (%p40_p1, %s39_s19), 0  ;;  %s3791_s29 = smov (!%p40_p1, %s42_s29), %s2667_s21 }
  0x3c   : > { %3692 = sst [smem:[#allocation26_spill]] %s3789_s19  ;;  %s47_s28 = ssub.s32 %s2663_s20, %s3789_s19 }
  0x3d   : > { %p44_p6 = scmp.ge.s32.totalorder %s3791_s29, 2  ;;  %p98_p9 = scmp.ne.s32.totalorder %s2635_s13, %s2631_s12 }
  0x3e   : > { %p2876_p11 = por %p92_p8, %p3663_p3  ;;  %p3696_p12 = scmp.eq.s32.totalorder %s2810_s23, 0 }
  0x3f   : > { %s3793_s29 = smov (%p44_p6, %s3791_s29), 0  ;;  %p3662_p0 = scmp.lt.s32.totalorder %s2671_s22, 4 }
  0x40   : > { %3693 = sst [smem:[#allocation27_spill]] %s3793_s29  ;;  %s2864_s8 = ssub.s32 %s2667_s21, %s3793_s29 }
  0x41   : > { %3694 = sst [smem:[#allocation28_spill]] %s2864_s8  ;;  %s2869_s4 = sor.u32 %s47_s28, %s2864_s8 }
  0x42   : > { %p2882_p13 = por %p98_p9, %p3696_p12  ;;  %s378_s29 = sand.u32 1, %s2671_s22  }
  0x43   : > { %p3661_p2 = scmp.eq.s32.totalorder %s2864_s8, 0  ;;  %s380_s28 = sand.u32 1, %s2639_s14  }
  0x44   : > { %s3697_s9 = scalar_select %p2882_p13, 1, 0 }
  0x45   : > { %s2894_s19 = scalar_select %p3661_p2, %s2639_s14, %s85_s26  }
  0x46   : > { %3698 = sst [smem:[#allocation29_spill]] %s3697_s9  ;;  %s1945_s12 = sshll.u32 %s380_s28, 3 }
  0x47   : > { %3699 = sst [smem:[#allocation30_spill]] %s2894_s19  ;;  %s3660_s18 = sshll.u32 %s2667_s21, 8 }
  0x48   : > { %s3700_s1 = sld [smem:[#allocation39_spill]]  ;;  %s382_s9 = scalar_lea.vmem [#allocation6], %s1945_s12 }
  0x49   : > { %s394_s3 = sshll.u32 %s382_s9, 4  ;;  %p2908_p4 = pnand %p3662_p0, %p2876_p11  ;;  %s2912_s3 = int_to_ptr.vmem [resolvable:$true] %s394_s3 }
  0x4a   : > { %s2676_s26 = smov [#allocation11]   ;;  %s2916_s24 = scalar_lea.sflag [#allocation7], %s378_s29 }
  0x4b   : > { %s2914_s13 = sshll.u32 %s2676_s26, 4  ;;  %p2361_p6 = pneg %p2908_p4  ;;  %s326_s13 = int_to_ptr.vmem [resolvable:$true] %s2914_s13 }
  0x4e   : > { %s2902_s2 = scalar_lea.hbm %s3700_s1, %s3660_s18  ;;  %s2364_s12 = scalar_lea.hbm %s3700_s1, 512 }
  0x4f   : > { %s2359_s28 = scalar_lea.hbm %s2902_s2, 128  ;;  %p2365_p11 = scmp.lt.u32.totalorder %s2902_s2, %s3700_s1 }
  0x50   : > { %p2360_p1 = scmp.ne.s32.totalorder %s2902_s2, %s2359_s28  ;;  %p2366_p12 = scmp.lt.u32.totalorder %s2364_s12, %s2359_s28 }
  0x51   : > { %p2368_p0 = scmp.lt.u32.totalorder %s2359_s28, %s2902_s2 }
  0x52   : > { %p2362_p8 = pnand %p2361_p6, %p2360_p1  ;;  %p2367_p2 = por %p2366_p12, %p2365_p11 }
  0x54   : > { %p2363_p9 = pneg %p2362_p8  ;;  %p2369_p3 = por %p2368_p0, %p2367_p2 }
  0x56   : > { %p2370_p10 = pnand %p2369_p3, %p2363_p9 }
  0x58   : > { %2373 = shalt.err (!%p2370_p10)
}
  0x59   : > { %s2374_s29 = scalar_lea.vmem %s2912_s3, 128  ;;  %s2677_s26 = smov [#allocation6]  }
  0x5a   : > { %p2375_p1 = scmp.ne.s32.totalorder %s2912_s3, %s2374_s29  ;;  %s2379_s6 = sshll.u32 %s2677_s26, 4  ;;  %s2380_s6 = int_to_ptr.vmem [resolvable:$false] %s2379_s6 }
  0x5b   : > { %s2381_s18 = scalar_lea.vmem %s2380_s6, 256  ;;  %p2382_p5 = scmp.lt.s32.totalorder %s2912_s3, %s2380_s6 }
  0x5c   : > { %p2377_p8 = pnand %p2375_p1, %p2361_p6  ;;  %p2383_p11 = scmp.lt.s32.totalorder %s2381_s18, %s2374_s29 }
  0x5e   : > { %p2378_p13 = pneg %p2377_p8  ;;  %p2384_p12 = por %p2383_p11, %p2382_p5 }
  0x60   : > { %p2385_p0 = pnand %p2384_p12, %p2378_p13 }
  0x62   : > { %2388 = shalt.err (!%p2385_p0)
}
  0x63   : > { %2110 = dma.hbm_to_vmem [thread:$0]  (!%p2908_p4), %s2902_s2, 128, %s2912_s3, %s2916_s24  }
  0x64   : > { %s2389_s9 = scalar_lea.hbm %s3643_s5, 1024 }
  0x65   : > { %p2390_p3 = scmp.ne.s32.totalorder %s3643_s5, %s2389_s9  ;;  %p2396_p13 = scmp.lt.u32.totalorder %s2389_s9, %s3643_s5 }
  0x67   : > { %p2392_p5 = pnand %p2390_p3, %p2835_p7 }
  0x69   : > { %p2393_p10 = pneg %p2392_p5 }
  0x6b   : > { %p2398_p2 = pnand %p2396_p13, %p2393_p10 }
  0x6d   : > { %2401 = shalt.err (!%p2398_p2)
}
  0x6e   : > { %s2402_s6 = scalar_lea.vmem %s326_s13, 1024  ;;  %p2410_p1 = scmp.lt.s32.totalorder %s326_s13, %s326_s13 }
  0x6f   : > { %p2403_p4 = scmp.ne.s32.totalorder %s326_s13, %s2402_s6  ;;  %p2411_p8 = scmp.lt.s32.totalorder %s2402_s6, %s2402_s6 }
  0x71   : > { %p2405_p6 = pnand %p2403_p4, %p2835_p7  ;;  %p2412_p11 = por %p2411_p8, %p2410_p1 }
  0x73   : > { %p2406_p9 = pneg %p2405_p6 }
  0x75   : > { %p2413_p12 = pnand %p2412_p11, %p2406_p9 }
  0x77   : > { %2416 = shalt.err (!%p2413_p12)
}
  0x78   : > { %s2678_s2 = smov 512   ;;  %s2679_s3 = smov 32  }
  0x79   : > { %p3702_p0 = scmp.ne.s32.totalorder %s3689_s27, 0  ;;  %s2680_s28 = smov [#allocation12]  }
  0x7a   : > { %s341_s9 = sshll.u32 %s2680_s28, 4  ;;  %s2417_s29 = scalar_lea.hbm %s3645_s7, 4096  ;;  %s342_s9 = int_to_ptr.vmem [resolvable:$true] %s341_s9 }
  0x7b   : > { %2100 = dma.hbm_to_vmem [thread:$0]  (!%p3702_p0), %s3643_s5, 1024, %s326_s13, [#allocation10], %s2678_s2, %s2678_s2, %s2679_s3  }
  0x7c   : > { %p2418_p3 = scmp.ne.s32.totalorder %s3645_s7, %s2417_s29  ;;  %p2424_p13 = scmp.lt.u32.totalorder %s2417_s29, %s3645_s7 }
  0x7e   : > { %p2420_p5 = pnand %p2418_p3, %p2835_p7 }
  0x80   : > { %p2421_p10 = pneg %p2420_p5 }
  0x82   : > { %p2426_p2 = pnand %p2424_p13, %p2421_p10 }
  0x84   : > { %2429 = shalt.err (!%p2426_p2)
}
  0x85   : > { %s2430_s13 = scalar_lea.vmem %s342_s9, 4096  ;;  %p2438_p1 = scmp.lt.s32.totalorder %s342_s9, %s342_s9 }
  0x86   : > { %p2431_p4 = scmp.ne.s32.totalorder %s342_s9, %s2430_s13  ;;  %p2439_p8 = scmp.lt.s32.totalorder %s2430_s13, %s2430_s13 }
  0x88   : > { %p2433_p6 = pnand %p2431_p4, %p2835_p7  ;;  %p2440_p11 = por %p2439_p8, %p2438_p1 }
  0x8a   : > { %p2434_p9 = pneg %p2433_p6 }
  0x8c   : > { %p2441_p12 = pnand %p2440_p11, %p2434_p9 }
  0x8e   : > { %2444 = shalt.err (!%p2441_p12)
}
  0x8f   : > { %s2681_s2 = smov 64   ;;  %s2682_s1 = smov 4  }
  0x90   : > { %2103 = dma.hbm_to_vmem [thread:$0]  (!%p3702_p0), %s3645_s7, 4096, %s342_s9, [#allocation13], %s2681_s2, %s2681_s2, %s2682_s1  }
  0x91   : > { %s1934_s3 = sadd.s32 4294967294, %s2671_s22   ;;  %s51_s18 = sadd.s32 1, %s2651_s17 }
  0x92   : > { %p3703_p7 = scmp.eq.s32.totalorder %s2869_s4, 0  ;;  %p58_p3 = scmp.ne.s32.totalorder %s2651_s17, %s2647_s16 }
  0x93   : > { %p64_p5 = scmp.ne.s32.totalorder %s2647_s16, %s2643_s15  ;;  %p284_p10 = scmp.eq.s32.totalorder %s2810_s23, 3 }
  0x94   : > { %s2986_s19 = scalar_select %p3703_p7, %s2651_s17, %s51_s18  }
  0x95   : > { %p290_p13 = scmp.eq.s32.totalorder %s1934_s3, 3  ;;  %p3704_p2 = scmp.eq.s32.totalorder %s2671_s22, 0 }
  0x96   : > { %p3705_p6 = scmp.eq.s32.totalorder %s2810_s23, 0  ;;  %p3001_p1 = por %p284_p10, %p58_p3 }
  0x97   : > { %p60_p4 = por %p3704_p2, %p58_p3  ;;  %p3005_p0 = por %p290_p13, %p64_p5 }
  0x98   : > { %p2997_p9 = por %p3705_p6, %p64_p5  ;;  %s358_s9 = sand.u32 1, %s2651_s17  }
  0x99   : > { %s3707_s27 = scalar_select %p3001_p1, 1, 0 }
  0x9a   : > { %s3708_s4 = scalar_select %p3005_p0, 1, 0 }
  0x9b   : > { %s3709_s12 = sshll.u32 %s2667_s21, 1  ;;  %s1942_s29 = sshll.u32 %s358_s9, 3 }
  0x9c   : > { %s367_s26 = sadd.s32 %s2663_s20, %s3709_s12  ;;  %s362_s1 = scalar_lea.vmem [#allocation3], %s1942_s29 }
  0x9d   : > { %s1944_s8 = sshll.u32 %s367_s26, 7  ;;  %s371_s14 = sshll.u32 %s362_s1, 4  ;;  %s3018_s14 = int_to_ptr.vmem [resolvable:$true] %s371_s14 }
  0x9e   : > { %s3016_s2 = scalar_lea.hbm %s3638_s0, %s1944_s8  ;;  %p3710_p8 = scmp.lt.s32.totalorder %s2671_s22, 4 }
  0x9f   : > { %s359_s3 = scalar_lea.sflag [#allocation4], %s358_s9  ;;  %s2445_s18 = scalar_lea.hbm %s3016_s2, 128 }
  0xa0   : > { %p3022_p11 = pnand %p3710_p8, %p60_p4  ;;  %p2446_p12 = scmp.ne.s32.totalorder %s3016_s2, %s2445_s18 }
  0xa1   : > { %s2450_s29 = scalar_lea.hbm %s3638_s0, 512  ;;  %p2451_p10 = scmp.lt.u32.totalorder %s3016_s2, %s3638_s0 }
  0xa2   : > { %p2447_p7 = pneg %p3022_p11  ;;  %p2452_p13 = scmp.lt.u32.totalorder %s2450_s29, %s2445_s18 }
  0xa3   : > { %p2454_p4 = scmp.lt.u32.totalorder %s2445_s18, %s3016_s2 }
  0xa4   : > { %p2448_p3 = pnand %p2447_p7, %p2446_p12  ;;  %p2453_p2 = por %p2452_p13, %p2451_p10 }
  0xa6   : > { %p2449_p5 = pneg %p2448_p3  ;;  %p2455_p6 = por %p2454_p4, %p2453_p2 }
  0xa8   : > { %p2456_p8 = pnand %p2455_p6, %p2449_p5 }
  0xaa   : > { %2459 = shalt.err (!%p2456_p8)
}
  0xab   : > { %s2460_s9 = scalar_lea.vmem %s3018_s14, 128  ;;  %s2683_s13 = smov [#allocation3]  }
  0xac   : > { %p2461_p12 = scmp.ne.s32.totalorder %s3018_s14, %s2460_s9  ;;  %s2465_s1 = sshll.u32 %s2683_s13, 4  ;;  %s2466_s1 = int_to_ptr.vmem [resolvable:$false] %s2465_s1 }
  0xad   : > { %s2467_s12 = scalar_lea.vmem %s2466_s1, 256  ;;  %p2468_p1 = scmp.lt.s32.totalorder %s3018_s14, %s2466_s1 }
  0xae   : > { %p2463_p3 = pnand %p2461_p12, %p2447_p7  ;;  %p2469_p10 = scmp.lt.s32.totalorder %s2467_s12, %s2460_s9 }
  0xb0   : > { %p2464_p0 = pneg %p2463_p3  ;;  %p2470_p13 = por %p2469_p10, %p2468_p1 }
  0xb2   : > { %p2471_p2 = pnand %p2470_p13, %p2464_p0 }
  0xb4   : > { %2474 = shalt.err (!%p2471_p2)
}
  0xb5   : > { %s3712_s18 = sld [smem:[#allocation28_spill]]  ;;  %s119_s26 = sadd.s32 1, %s2627_s11 }
  0xb6   : > { %2107 = dma.hbm_to_vmem [thread:$0]  (!%p3022_p11), %s3016_s2, 128, %s3018_s14, %s359_s3  }
  0xb7   : > { %p126_p1 = scmp.ne.s32.totalorder %s2627_s11, %s2623_s10  ;;  %p132_p0 = scmp.ne.s32.totalorder %s2623_s10, %s2619_s30 }
  0xb8   : > { %s403_s29 = sand.u32 1, %s2627_s11   ;;  %p3713_p7 = scmp.eq.s32.totalorder %s2671_s22, 0 }
  0xb9   : > { %p3714_p4 = scmp.eq.s32.totalorder %s2810_s23, 0  ;;  %s1949_s8 = sshll.u32 %s403_s29, 3 }
  0xba   : > { %p128_p5 = por %p126_p1, %p3713_p7  ;;  %s3716_s6 = sshll.u32 %s2667_s21, 8 }
  0xbb   : > { %p3061_p6 = por %p132_p0, %p3714_p4  ;;  %s2615_s9 = sadd.s32 128, %s3716_s6 }
  0xbc   : > { %s405_s13 = scalar_lea.vmem [#allocation8], %s1949_s8  ;;  %p3717_p8 = scmp.eq.s32.totalorder %s3712_s18, 0 }
  0xbd   : > { %s3715_s25 = scalar_select %p3061_p6, 1, 0 }
  0xbe   : > { %s417_s1 = sshll.u32 %s405_s13, 4  ;;  %s3718_s3 = sld [smem:[#allocation40_spill]]  ;;  %s3077_s1 = int_to_ptr.vmem [resolvable:$true] %s417_s1 }
  0xbf   : > { %s3070_s12 = scalar_select %p3717_p8, %s2627_s11, %s119_s26  }
  0xc0   : > { %p3719_p11 = scmp.lt.s32.totalorder %s2671_s22, 4 }
  0xc2   : > { %p3081_p12 = pnand %p3719_p11, %p128_p5 }
  0xc4   : > { %s3075_s30 = scalar_lea.hbm %s3718_s3, %s2615_s9  ;;  %p2477_p10 = pneg %p3081_p12 }
  0xc5   : > { %s2475_s18 = scalar_lea.hbm %s3075_s30, 128  ;;  %s2480_s6 = scalar_lea.hbm %s3718_s3, 512 }
  0xc6   : > { %p2476_p3 = scmp.ne.s32.totalorder %s3075_s30, %s2475_s18  ;;  %p2481_p1 = scmp.lt.u32.totalorder %s3075_s30, %s3718_s3 }
  0xc7   : > { %p2482_p0 = scmp.lt.u32.totalorder %s2480_s6, %s2475_s18  ;;  %p2484_p5 = scmp.lt.u32.totalorder %s2475_s18, %s3075_s30 }
  0xc8   : > { %p2478_p13 = pnand %p2477_p10, %p2476_p3 }
  0xc9   : > { %p2483_p7 = por %p2482_p0, %p2481_p1 }
  0xca   : > { %p2479_p2 = pneg %p2478_p13 }
  0xcb   : > { %p2485_p4 = por %p2484_p5, %p2483_p7 }
  0xcd   : > { %p2486_p8 = pnand %p2485_p4, %p2479_p2 }
  0xcf   : > { %2489 = shalt.err (!%p2486_p8)
}
  0xd0   : > { %s2490_s2 = scalar_lea.vmem %s3077_s1, 128  ;;  %s2684_s14 = smov [#allocation8]  }
  0xd1   : > { %p2491_p11 = scmp.ne.s32.totalorder %s3077_s1, %s2490_s2  ;;  %s2495_s26 = sshll.u32 %s2684_s14, 4  ;;  %s2496_s26 = int_to_ptr.vmem [resolvable:$false] %s2495_s26 }
  0xd2   : > { %s2497_s8 = scalar_lea.vmem %s2496_s26, 256  ;;  %p2498_p6 = scmp.lt.s32.totalorder %s3077_s1, %s2496_s26 }
  0xd3   : > { %p2493_p3 = pnand %p2491_p11, %p2477_p10  ;;  %p2499_p1 = scmp.lt.s32.totalorder %s2497_s8, %s2490_s2 }
  0xd5   : > { %p2494_p13 = pneg %p2493_p3  ;;  %p2500_p0 = por %p2499_p1, %p2498_p6 }
  0xd7   : > { %p2501_p7 = pnand %p2500_p0, %p2494_p13 }
  0xd9   : > { %2504 = shalt.err (!%p2501_p7)
}
  0xda   : > { %2113 = dma.hbm_to_vmem [thread:$0]  (!%p3081_p12), %s3075_s30, 128, %s3077_s1, %s2916_s24  }
  0xdb   : > { %s3721_s18 = sld [smem:[#allocation25_spill]] }
  0xe1   : > { %p3722_p2 = scmp.ne.s32.totalorder %s3721_s18, 0 }
  0xe3   : > { %426 = sbr.rel (%p3722_p2) target bundleno = 916 (0x394), region = 56 }
  0xea   : > { %s3114_s6 = sand.u32 1, %s2647_s16  }
  0xeb   : > { %s1953_s9 = sshll.u32 %s3114_s6, 3  ;;  %s429_s13 = scalar_lea.sflag [#allocation4], %s3114_s6 }
  0xec   : > { %s3120_s2 = scalar_lea.vmem [#allocation3], %s1953_s9 }
  0xed   : > { %2590 = dma.done.wait (%p2997_p9), %s429_s13, 128  }
  0xee   : > { %2592 = vsyncadd (%p2997_p9), %s429_s13, 4294967168  ;;  %s3723_s24 = sld [smem:[#allocation21_spill]]  ;;  %s3724_s1 = sld [smem:[#allocation29_spill]] }
  0xef   : > { %s437_s30 = sand.u32 1, %s2810_s23  }
  0xf0   : > { %s438_s26 = scalar_lea.sflag [#allocation7], %s437_s30 }
  0xf4   : > { %s439_s29 = sand.u32 1, %s3723_s24   ;;  %p3725_p6 = scmp.ne.s32.totalorder %s3724_s1, 0 }
  0xf5   : > { %s3128_s14 = sshll.u32 %s439_s29, 3 }
  0xf6   : > { %s441_s8 = scalar_lea.vmem [#allocation6], %s3128_s14 }
  0xf7   : > { %2594 = dma.done.wait (%p3725_p6), %s438_s26, 128  }
  0xf8   : > { %2596 = vsyncadd (%p3725_p6), %s438_s26, 4294967168  ;;  %s448_s18 = sand.u32 1, %s2623_s10   ;;  %p3726_p9 = scmp.ne.s32.totalorder %s3715_s25, 0 }
  0xf9   : > { %s3136_s28 = sshll.u32 %s448_s18, 3 }
  0xfa   : > { %s450_s13 = scalar_lea.vmem [#allocation8], %s3136_s28 }
  0xfb   : > { %2598 = dma.done.wait (%p3726_p9), %s438_s26, 128  }
  0xfc   : > { %2600 = vsyncadd (%p3726_p9), %s438_s26, 4294967168  ;;  %p3727_p12 = scmp.eq.s32.totalorder %s2810_s23, 0 }
  0xfe   : > { %2602 = dma.done.wait (%p3727_p12), [#allocation10], 5120   ;;  %p3728_p10 = pmov %p3727_p12 }
 0x100   : > { %2604 = vsyncadd (%p3728_p10), [#allocation10], 4294962176  ;;  %p3729_p5 = pmov %p3728_p10 }
 0x102   : > { %2606 = dma.done.wait (%p3729_p5), [#allocation13], 4096   ;;  %p3730_p4 = pmov %p3729_p5 }
 0x103   : > { %v2685_v0 = vmov 0   ;;  %v2250_v1 = vld [vmem:[#allocation9 + $0x4] ss:$16 sps:$4 sm:$0xff]   ;;  %v2252_v2 = vld [vmem:[#allocation9 + $0xc] ss:$16 sps:$4 sm:$0xff]   ;;  %s3731_s23 = sld [smem:[#allocation23_spill]]  ;;  %v557_v39 = vlaneseq }
 0x104   : > { %2608 = vsyncadd (%p3730_p4), [#allocation13], 4294963200  ;;  %769 = vmatprep.mubr.bf16.mxu0 %v2685_v0  ;;  %812 = vmatprep.mubr.bf16.mxu1 %v2685_v0  ;;  %v2254_v3 = vld [vmem:[#allocation9] ss:$16 sps:$4 sm:$0xff]   ;;  %v2255_v4 = vld [vmem:[#allocation9 + $0x8] ss:$16 sps:$4 sm:$0xff]  }
 0x105   : > { %737 = vmatprep.subr.bf16.mxu0 %v2250_v1  ;;  %780 = vmatprep.subr.bf16.mxu1 %v2252_v2  ;;  %v2256_v5 = vld [vmem:[#allocation9 + $0x24] ss:$16 sps:$4 sm:$0xff]   ;;  %v2258_v6 = vld [vmem:[#allocation9 + $0x2c] ss:$16 sps:$4 sm:$0xff]   ;;  %v2260_v7 = vld [vmem:[#allocation9 + $0x20] ss:$16 sps:$4 sm:$0xff]  }
 0x106   : > { %738 = vmatpush1.bf16.msra.mxu0 %v2254_v3  ;;  %781 = vmatpush1.bf16.msra.mxu1 %v2255_v4  ;;  %v2261_v8 = vld [vmem:[#allocation9 + $0x28] ss:$16 sps:$4 sm:$0xff]   ;;  %v2262_v9 = vld [vmem:[#allocation9 + $0x44] ss:$16 sps:$4 sm:$0xff]   ;;  %v2264_v10 = vld [vmem:[#allocation9 + $0x4c] ss:$16 sps:$4 sm:$0xff]  }
 0x107   : > { %739 = vmatprep.subr.bf16.mxu0 %v2256_v5  ;;  %782 = vmatprep.subr.bf16.mxu1 %v2258_v6  ;;  %v2266_v11 = vld [vmem:[#allocation9 + $0x40] ss:$16 sps:$4 sm:$0xff]   ;;  %v2267_v12 = vld [vmem:[#allocation9 + $0x48] ss:$16 sps:$4 sm:$0xff]   ;;  %v2268_v13 = vld [vmem:[#allocation9 + $0x64] ss:$16 sps:$4 sm:$0xff]  }
 0x108   : > { %v2270_v14 = vld [vmem:[#allocation9 + $0x6c] ss:$16 sps:$4 sm:$0xff]   ;;  %v2272_v15 = vld [vmem:[#allocation9 + $0x60] ss:$16 sps:$4 sm:$0xff]   ;;  %v2273_v16 = vld [vmem:[#allocation9 + $0x68] ss:$16 sps:$4 sm:$0xff]  }
 0x109   : > { %v2274_v17 = vld [vmem:[#allocation9 + $0x84] ss:$16 sps:$4 sm:$0xff]   ;;  %v2276_v18 = vld [vmem:[#allocation9 + $0x8c] ss:$16 sps:$4 sm:$0xff]   ;;  %v2278_v19 = vld [vmem:[#allocation9 + $0x80] ss:$16 sps:$4 sm:$0xff]  }
 0x10a   : > { %740 = vmatpush1.bf16.msra.mxu0 %v2260_v7  ;;  %783 = vmatpush1.bf16.msra.mxu1 %v2261_v8  ;;  %v2279_v20 = vld [vmem:[#allocation9 + $0x88] ss:$16 sps:$4 sm:$0xff]   ;;  %v2280_v21 = vld [vmem:[#allocation9 + $0xa4] ss:$16 sps:$4 sm:$0xff]   ;;  %v2282_v22 = vld [vmem:[#allocation9 + $0xac] ss:$16 sps:$4 sm:$0xff]  }
 0x10b   : > { %741 = vmatprep.subr.bf16.mxu0 %v2262_v9  ;;  %784 = vmatprep.subr.bf16.mxu1 %v2264_v10  ;;  %v2284_v23 = vld [vmem:[#allocation9 + $0xa0] ss:$16 sps:$4 sm:$0xff]   ;;  %v2285_v24 = vld [vmem:[#allocation9 + $0xa8] ss:$16 sps:$4 sm:$0xff]   ;;  %v2286_v25 = vld [vmem:[#allocation9 + $0xc4] ss:$16 sps:$4 sm:$0xff]  }
 0x10c   : > { %v2288_v26 = vld [vmem:[#allocation9 + $0xcc] ss:$16 sps:$4 sm:$0xff]   ;;  %v2290_v29 = vld [vmem:[#allocation9 + $0xc0] ss:$16 sps:$4 sm:$0xff]   ;;  %v2291_v30 = vld [vmem:[#allocation9 + $0xc8] ss:$16 sps:$4 sm:$0xff]  }
 0x10d   : > { %v514_v27 = vld [vmem:[%s441_s8 + $0x7] sm:$0x1]  ;;  %v516_v28 = vld [vmem:[%s3120_s2] sm:$0xff]  ;;  %v558_v40 = vshrl.u32 %v557_v39, 7  ;;  %p842_p8 = scmp.eq.s32.totalorder %s3731_s23, 0  ;;  %s3734_s1 = sld [smem:[#allocation42_spill]] }
 0x10e   : > { %742 = vmatpush1.bf16.msra.mxu0 %v2266_v11  ;;  %785 = vmatpush1.bf16.msra.mxu1 %v2267_v12  ;;  %515 = vst [vmem:[#allocation2] sm:$0x1] %v514_v27  ;;  %517 = vst [vmem:[#allocation2 + $0x1] sm:$0xff] %v516_v28  ;;  %v518_v31 = vld [vmem:[%s450_s13] sm:$0x1]  ;;  %p850_p11 = scmp.eq.s32.totalorder %s3731_s23, 1 }
 0x10f   : > { %743 = vmatprep.subr.bf16.mxu0 %v2268_v13  ;;  %786 = vmatprep.subr.bf16.mxu1 %v2270_v14  ;;  %v2292_v32 = vld [vmem:[#allocation9 + $0xe4] ss:$16 sps:$4 sm:$0xff]   ;;  %v2294_v33 = vld [vmem:[#allocation9 + $0xec] ss:$16 sps:$4 sm:$0xff]   ;;  %519 = vst [vmem:[#allocation2 + $0x9] sm:$0x1] %v518_v31 }
 0x110   : > { %v2296_v34 = vld [vmem:[#allocation9 + $0xe0] ss:$16 sps:$4 sm:$0xff]   ;;  %v2297_v35 = vld [vmem:[#allocation9 + $0xe8] ss:$16 sps:$4 sm:$0xff]   ;;  %v3158_v41 = vsub.s32 0, %v558_v40  ;;  %v3160_v42 = vsub.s32 2, %v558_v40 }
 0x111   : > { %s845_s25 = scalar_select %p842_p8, 1, 0  ;;  %v3165_v44 = vsub.s32 1, %v558_v40  ;;  %v3167_v45 = vsub.s32 3, %v558_v40  ;;  %vm843_vm0 = vcmp.eq.s32.totalorder %v558_v40, 0  ;;  %v841_v62 = vadd.s32 8, %v558_v40 }
 0x112   : > { %744 = vmatpush1.bf16.msra.mxu0 %v2272_v15  ;;  %787 = vmatpush1.bf16.msra.mxu1 %v2273_v16  ;;  %3732 = vst [vmem:[#allocation31_spill] sm:$0xff] %v3158_v41  ;;  %3733 = vst [vmem:[#allocation32_spill] sm:$0xff] %v3160_v42  ;;  %s3174_s30 = scalar_select %p850_p11, 1, 0  ;;  %vm1055_vm6 = vcmask 1046528   ;;  %vm1233_vm7 = vcmask 1045504  }
 0x113   : > { %745 = vmatprep.subr.bf16.mxu0 %v2274_v17  ;;  %788 = vmatprep.subr.bf16.mxu1 %v2276_v18  ;;  %v555_v43 = vld [vmem:[%s3734_s1] sm:$0xf]  ;;  %3735 = vst [vmem:[#allocation33_spill] sm:$0xff] %v3165_v44  ;;  %3736 = vst [vmem:[#allocation34_spill] sm:$0xff] %v3167_v45  ;;  %v846_v48 = vstv %s845_s25  ;;  %vm852_vm3 = vcmp.eq.s32.totalorder %v841_v62, 9  ;;  %s2686_s29 = smov 32  }
 0x114   : > { %v560_v46 = vrot.slane %v555_v43, %v3158_v41  ;;  %v568_v47 = vrot.slane %v555_v43, %v3160_v42  ;;  %v564_v49 = vrot.slane %v555_v43, %v3165_v44  ;;  %v572_v50 = vrot.slane %v555_v43, %v3167_v45  ;;  %s2687_s14 = smov 96   ;;  %s3745_s18 = sld [smem:[#allocation43_spill]] }
 0x115   : > { %v520_v36 = vld [vmem:[#allocation2] sm:$0xff]  ;;  %vm3176_vm1 = vcmp.eq.s32.totalorder %v846_v48, 1  ;;  %v854_v63 = vstv %s3174_s30  ;;  %s3765_s28 = sld [smem:[#allocation24_spill]]  ;;  %p3769_p13 = scmp.ne.s32.totalorder %s3707_s27, 0 }
 0x116   : > { %746 = vmatpush1.bf16.msra.mxu0 %v2278_v19  ;;  %789 = vmatpush1.bf16.msra.mxu1 %v2279_v20  ;;  %v521_v37 = vld [vmem:[#allocation2 + $0x8] sm:$0x3]  ;;  %vm3184_vm2 = vmand %vm3176_vm1, %vm843_vm0  ;;  %vm855_vm4 = vcmp.eq.s32.totalorder %v854_v63, 1  ;;  %s3766_s24 = sld [smem:[#allocation44_spill]] }
 0x117   : > { %747 = vmatprep.subr.bf16.mxu0 %v2280_v21  ;;  %790 = vmatprep.subr.bf16.mxu1 %v2282_v22  ;;  %v522_v38 = vpack.c.bf16 %v521_v37, %v520_v36  ;;  %v1077_v21 = vld [vmem:[#allocation11 + $0x4] ss:$8 sm:$0xf]  ;;  %vm3200_vm5 = vmand %vm855_vm4, %vm852_vm3 }
 0x118   : > { %v1082_v31 = vrot.slane %v1077_v21, %v3158_v41  ;;  %v1086_v36 = vrot.slane %v1077_v21, %v3165_v44 }
 0x11a   : > { %748 = vmatpush1.bf16.msra.mxu0 %v2284_v23  ;;  %791 = vmatpush1.bf16.msra.mxu1 %v2285_v24  ;;  %v2303_v24 = vld [vmem:[#allocation12 + $0x8] sm:$0xff]  }
 0x11b   : > { %749 = vmatprep.subr.bf16.mxu0 %v2286_v25  ;;  %792 = vmatprep.subr.bf16.mxu1 %v2288_v26  ;;  %v1255_v26 = vld [vmem:[#allocation11 + $0x7] ss:$8 sm:$0xf]  ;;  %s2026_s13 = sshll.u32 %s3765_s28, 1 }
 0x11c   : > { %v1264_v37 = vrot.slane %v1255_v26, %v3165_v44  ;;  %s1768_s1 = sadd.s32 %s3731_s23, %s2026_s13  ;;  %s1757_s23 = scalar_lea.sflag [#allocation5], %s3114_s6 }
 0x11d   : > { %s2027_s30 = sshll.u32 %s1768_s1, 7 }
 0x11e   : > { %750 = vmatpush1.bf16.msra.mxu0 %v2290_v29  ;;  %793 = vmatpush1.bf16.msra.mxu1 %v2291_v30  ;;  %v1090_v29 = vrot.slane %v1077_v21, %v3160_v42 }
 0x11f   : > { %751 = vmatprep.subr.bf16.mxu0 %v2292_v32  ;;  %794 = vmatprep.subr.bf16.mxu1 %v2294_v33  ;;  %v1268_v33 = vrot.slane %v1255_v26, %v3160_v42 }
 0x122   : > { %752 = vmatpush1.bf16.msra.mxu0 %v2296_v34  ;;  %795 = vmatpush1.bf16.msra.mxu1 %v2297_v35  ;;  %v1260_v35 = vrot.slane %v1255_v26, %v3158_v41 }
 0x125   : > { %770 = vmatmul.mubr.bf16.vlgmr.msra.gmra.mrb[0].mxu0 %v522_v38  ;;  %813 = vmatmul.mubr.bf16.vlgmr.msra.gmra.mrb[0].mxu1 %v522_v38 }
 0x1f8   : > { %v771_v51 = vpop.f32.mrb[0].mxu0  ;;  %v814_v52 = vpop.f32.mrb[0].mxu1 }
 0x1f9   : > { %v772_v53 = vadd.f32 %v771_v51, %v560_v46  ;;  %v815_v55 = vadd.f32 %v814_v52, %v568_v47  ;;  %v773_v56 = vpop.f32.mrb[1].mxu0  ;;  %v816_v57 = vpop.f32.mrb[1].mxu1 }
 0x1fa   : > { %v774_v58 = vadd.f32 %v773_v56, %v564_v49  ;;  %v817_v59 = vadd.f32 %v816_v57, %v572_v50  ;;  %v775_v60 = vpop.f32.mrb[2].mxu0  ;;  %v818_v61 = vpop.f32.mrb[2].mxu1  ;;  %v2299_v56 = vld [vmem:[#allocation12] sm:$0xff]  }
 0x1fb   : > { %v823_v0 = vmax.f32 %v772_v53, 0.0  ;;  %v825_v1 = vmax.f32 %v815_v55, 0.0  ;;  %v776_v2 = vadd.f32 %v775_v60, %v560_v46  ;;  %v819_v3 = vadd.f32 %v818_v61, %v568_v47  ;;  %v777_v4 = vpop.f32.mrb[3].mxu0  ;;  %v820_v5 = vpop.f32.mrb[3].mxu1  ;;  %v2298_v55 = vld [vmem:[#allocation12 + $0x40] sm:$0xff]  }
 0x1fc   : > { %v824_v7 = vmax.f32 %v774_v58, 0.0  ;;  %v778_v8 = vadd.f32 %v777_v4, %v564_v49  ;;  %v821_v9 = vadd.f32 %v820_v5, %v572_v50  ;;  %v826_v19 = vmax.f32 %v817_v59, 0.0  ;;  %v2300_v57 = vld [vmem:[#allocation12 + $0xc0] sm:$0xff]   ;;  %2030 = vmatprep.subr.bf16.mxu0 %v2298_v55  ;;  %v2321_v55 = vld [vmem:[#allocation12 + $0xa8] sm:$0xff]  }
 0x1fd   : > { %v831_v10 = vmin.f32 %v823_v0, 6.0  ;;  %v833_v11 = vmin.f32 %v825_v1, 6.0  ;;  %v827_v12 = vmax.f32 %v776_v2, 0.0  ;;  %v829_v13 = vmax.f32 %v819_v3, 0.0  ;;  %2052 = vmatprep.subr.bf16.mxu1 %v2300_v57  ;;  %2031 = vmatpush3.bf16.msra.mxu0 %v2299_v56  ;;  %v2322_v56 = vld [vmem:[#allocation12 + $0x70] sm:$0xff]  }
 0x1fe   : > { %v828_v14 = vmax.f32 %v778_v8, 0.0  ;;  %v830_v15 = vmax.f32 %v821_v9, 0.0  ;;  %v832_v18 = vmin.f32 %v824_v7, 6.0  ;;  %v834_v28 = vmin.f32 %v826_v19, 6.0  ;;  %v2324_v57 = vld [vmem:[#allocation12 + $0xf0] sm:$0xff]  }
 0x1ff   : > { %v3190_v16 = vsel %vm3184_vm2, 0.0, %v831_v10  ;;  %v3194_v17 = vsel %vm3184_vm2, 0.0, %v833_v11  ;;  %v835_v20 = vmin.f32 %v827_v12, 6.0  ;;  %v837_v22 = vmin.f32 %v829_v13, 6.0 }
 0x200   : > { %880 = vrot.lane.b32.xlu1 %v3194_v17, %s2686_s29  ;;  %872 = vrot.lane.b32.xlu0 %v3190_v16, %s2686_s29  ;;  %v836_v23 = vmin.f32 %v828_v14, 6.0  ;;  %v838_v25 = vmin.f32 %v830_v15, 6.0  ;;  %v3206_v27 = vsel %vm3184_vm2, 0.0, %v832_v18  ;;  %v3236_v40 = vsel %vm3184_vm2, 0.0, %v834_v28 }
 0x201   : > { %v3215_v30 = vsel %vm3200_vm5, 0.0, %v835_v20  ;;  %v3220_v32 = vsel %vm3200_vm5, 0.0, %v837_v22  ;;  %v1101_v46 = vmul.f32 %v1090_v29, %v3194_v17  ;;  %v1094_v47 = vrot.slane %v1077_v21, %v3167_v45  ;;  %v2301_v22 = vld [vmem:[#allocation12 + $0x80] sm:$0xff]  }
 0x202   : > { %v3225_v34 = vsel %vm3200_vm5, 0.0, %v836_v23  ;;  %v3232_v38 = vsel %vm3200_vm5, 0.0, %v838_v25  ;;  %v1103_v43 = vmul.f32 %v1082_v31, %v3215_v30  ;;  %v1105_v48 = vmul.f32 %v1090_v29, %v3220_v32  ;;  %v2302_v23 = vld [vmem:[#allocation12 + $0x48] sm:$0xff]   ;;  %2053 = vmatpush3.bf16.msra.mxu1 %v2301_v22 }
 0x203   : > { %v1104_v49 = vmul.f32 %v1086_v36, %v3225_v34  ;;  %v1272_v50 = vrot.slane %v1255_v26, %v3167_v45  ;;  %v1281_v51 = vmul.f32 %v1260_v35, %v3215_v30  ;;  %v1279_v52 = vmul.f32 %v1268_v33, %v3194_v17  ;;  %2032 = vmatprep.subr.bf16.mxu0 %v2302_v23 }
 0x204   : > { %903 = vrot.lane.b32.xlu1 %v3206_v27, %s2687_s14  ;;  %907 = vrot.lane.b32.xlu0 %v3194_v17, %s2687_s14  ;;  %v1283_v53 = vmul.f32 %v1268_v33, %v3220_v32  ;;  %v1106_v54 = vmul.f32 %v1094_v47, %v3232_v38  ;;  %v1099_v58 = vmul.f32 %v1082_v31, %v3190_v16  ;;  %v1116_v62 = vrot.slane %v1103_v43, 1  ;;  %v2304_v31 = vld [vmem:[#allocation12 + $0xc8] sm:$0xff]   ;;  %v2307_v43 = vld [vmem:[#allocation12 + $0x10] sm:$0xff]  }
 0x205   : > { %v1282_v59 = vmul.f32 %v1264_v37, %v3225_v34  ;;  %v1100_v60 = vmul.f32 %v1086_v36, %v3206_v27  ;;  %v1284_v61 = vmul.f32 %v1272_v50, %v3232_v38  ;;  %v1277_v63 = vmul.f32 %v1260_v35, %v3190_v16  ;;  %2033 = vmatpush3.bf16.msra.mxu0 %v2303_v24  ;;  %v2305_v36 = vld [vmem:[#allocation12 + $0x88] sm:$0xff]  }
 0x206   : > { %v1121_v0 = vrot.slane %v1101_v46, 1  ;;  %v1102_v1 = vmul.f32 %v1094_v47, %v3236_v40  ;;  %v1122_v2 = vrot.slane %v1105_v48, 1  ;;  %v1119_v3 = vrot.slane %v1104_v49, 1  ;;  %2054 = vmatprep.subr.bf16.mxu1 %v2304_v31  ;;  %v2308_v46 = vld [vmem:[#allocation12 + $0xd0] sm:$0xff]   ;;  %v2311_v48 = vld [vmem:[#allocation12 + $0x18] sm:$0xff]  }
 0x207   : > { %v1278_v4 = vmul.f32 %v1264_v37, %v3206_v27  ;;  %v1280_v5 = vmul.f32 %v1272_v50, %v3236_v40  ;;  %v1294_v6 = vrot.slane %v1281_v51, 2  ;;  %v1299_v7 = vrot.slane %v1279_v52, 2  ;;  %v2306_v37 = vld [vmem:[#allocation12 + $0x50] sm:$0xff]   ;;  %2055 = vmatpush3.bf16.msra.mxu1 %v2305_v36  ;;  %v2312_v49 = vld [vmem:[#allocation12 + $0xd8] sm:$0xff]   ;;  %v2314_v50 = vld [vmem:[#allocation12 + $0x60] sm:$0xff]  }
 0x208   : > { %911 = vrot.lane.b32.xlu1 %v3236_v40, %s2687_s14  ;;  %899 = vrot.lane.b32.xlu0 %v3190_v16, %s2687_s14  ;;  %v1300_v8 = vrot.slane %v1283_v53, 2  ;;  %v1125_v9 = vrot.slane %v1106_v54, 1  ;;  %v1297_v10 = vrot.slane %v1282_v59, 2  ;;  %v1118_v11 = vrot.slane %v1100_v60, 1  ;;  %v2309_v47 = vld [vmem:[#allocation12 + $0x90] sm:$0xff]   ;;  %v2316_v51 = vld [vmem:[#allocation12 + $0xe0] sm:$0xff]  }
 0x209   : > { %v1303_v12 = vrot.slane %v1284_v61, 2  ;;  %v1115_v13 = vrot.slane %v1099_v58, 1  ;;  %v1293_v14 = vrot.slane %v1277_v63, 2  ;;  %v1124_v15 = vrot.slane %v1102_v1, 1  ;;  %2034 = vmatprep.subr.bf16.mxu0 %v2306_v37  ;;  %2056 = vmatprep.subr.bf16.mxu1 %v2308_v46  ;;  %v2315_v52 = vld [vmem:[#allocation12 + $0x20] sm:$0xff]   ;;  %v2318_v54 = vld [vmem:[#allocation12 + $0x68] sm:$0xff]  }
 0x20a   : > { %v1296_v18 = vrot.slane %v1278_v4, 2  ;;  %v1302_v19 = vrot.slane %v1280_v5, 2  ;;  %v3269_v20 = vsel %vm1055_vm6, %v1118_v11, %v1119_v3  ;;  %v3272_v21 = vsel %vm1055_vm6, %v1121_v0, %v1122_v2  ;;  %2035 = vmatpush3.bf16.msra.mxu0 %v2307_v43  ;;  %v2317_v53 = vld [vmem:[#allocation12 + $0xa0] sm:$0xff]   ;;  %v2323_v58 = vld [vmem:[#allocation12 + $0x30] sm:$0xff]   ;;  %v2326_v60 = vld [vmem:[#allocation12 + $0x78] sm:$0xff]  }
 0x20b   : > { %v3275_v25 = vsel %vm1233_vm7, %v1299_v7, %v1300_v8  ;;  %v3278_v26 = vsel %vm1055_vm6, %v1124_v15, %v1125_v9  ;;  %v3281_v28 = vsel %vm1055_vm6, %v1115_v13, %v1116_v62  ;;  %v3284_v29 = vsel %vm1233_vm7, %v1293_v14, %v1294_v6  ;;  %2057 = vmatpush3.bf16.msra.mxu1 %v2309_v47  ;;  %v2325_v59 = vld [vmem:[#allocation12 + $0xb0] sm:$0xff]   ;;  %v2328_v61 = vld [vmem:[#allocation12 + $0xf8] sm:$0xff]  }
 0x20c   : > { %874 = vrot.lane.b32.xlu1 %v3215_v30, %s2686_s29  ;;  %876 = vrot.lane.b32.xlu0 %v3206_v27, %s2686_s29  ;;  %3743 = vst [vmem:[#allocation35_spill] sm:$0xff] %v3284_v29  ;;  %v3287_v33 = vsel %vm1233_vm7, %v1296_v18, %v1297_v10  ;;  %v3290_v35 = vsel %vm1233_vm7, %v1302_v19, %v1303_v12  ;;  %v2327_v62 = vld [vmem:[#allocation12 + $0x38] sm:$0xff]   ;;  %v3305_v0 = vand.u32 127, %v557_v39 }
 0x20d   : > { %3744 = vst [vmem:[#allocation36_spill] sm:$0xff] %v3290_v35  ;;  %2058 = vmatprep.subr.bf16.mxu1 %v2312_v49  ;;  %v2329_v63 = vld [vmem:[#allocation12 + $0xb8] sm:$0xff]  }
 0x20e   : > { %v955_v1 = vld [vmem:[#allocation11 + $0x1] ss:$8 sm:$0xf]  ;;  %v3311_v4 = vld [vmem:[#allocation11 + $0x2] ss:$8 sm:$0xf] }
 0x20f   : > { %v1136_v5 = vld [vmem:[#allocation11 + $0x5] ss:$8 sm:$0xf]  ;;  %v1314_v6 = vld [vmem:[#allocation11 + $0x20] ss:$8 sm:$0xf]  ;;  %v964_v7 = vrot.slane %v955_v1, %v3165_v44  ;;  %v968_v8 = vrot.slane %v955_v1, %v3160_v42  ;;  %v995_v9 = vrot.slane %v3311_v4, %v3165_v44  ;;  %v960_v39 = vrot.slane %v955_v1, %v3158_v41 }
 0x210   : > { %882 = vrot.lane.b32.xlu1 %v3220_v32, %s2686_s29  ;;  %884 = vrot.lane.b32.xlu0 %v3236_v40, %s2686_s29  ;;  %vm915_vm8 = vcmp.lt.s32.totalorder %v3305_v0, 96  ;;  %v972_v10 = vrot.slane %v955_v1, %v3167_v45  ;;  %v3321_v12 = vrot.slane %v1136_v5, %v3165_v44  ;;  %v3324_v13 = vrot.slane %v1314_v6, %v3165_v44  ;;  %v3331_v19 = vld [vmem:[#allocation11] ss:$8 sm:$0xf] }
 0x211   : > { %v999_v15 = vrot.slane %v3311_v4, %v3160_v42  ;;  %v3329_v18 = vrot.slane %v1136_v5, %v3160_v42  ;;  %v3334_v22 = vrot.slane %v1314_v6, %v3160_v42  ;;  %v991_v23 = vrot.slane %v3311_v4, %v3158_v41  ;;  %v1017_v36 = vld [vmem:[#allocation11 + $0x3] ss:$8 sm:$0xf]  ;;  %v1195_v37 = vld [vmem:[#allocation11 + $0x6] ss:$8 sm:$0xf] }
 0x212   : > { %v1003_v24 = vrot.slane %v3311_v4, %v3167_v45  ;;  %v3341_v31 = vrot.slane %v1136_v5, %v3158_v41  ;;  %v3346_v46 = vrot.slane %v1136_v5, %v3167_v45  ;;  %v3349_v47 = vrot.slane %v1314_v6, %v3158_v41 }
 0x213   : > { %vm890_vm9 = vcmp.lt.s32.totalorder %v3305_v0, 32  ;;  %v937_v49 = vrot.slane %v3331_v19, %v3160_v42  ;;  %v977_v1 = vmul.f32 %v960_v39, %v3190_v16 }
 0x214   : > { %878 = vrot.lane.b32.xlu1 %v3225_v34, %s2686_s29  ;;  %886 = vrot.lane.b32.xlu0 %v3232_v38, %s2686_s29  ;;  %s506_s29 = scalar_lea.vmem [#allocation14], %s1953_s9  ;;  %s2688_s9 = smov [#allocation14]  }
 0x215   : > { %s2509_s2 = sshll.u32 %s2688_s9, 4  ;;  %s2510_s2 = int_to_ptr.vmem [resolvable:$false] %s2509_s2 }
 0x218   : > { %909 = vrot.lane.b32.xlu1 %v3220_v32, %s2687_s14  ;;  %905 = vrot.lane.b32.xlu0 %v3225_v34, %s2687_s14  ;;  %v2310_v32 = vld [vmem:[#allocation12 + $0x58] sm:$0xff]  }
 0x219   : > { %v2313_v34 = vld [vmem:[#allocation12 + $0x98] sm:$0xff]   ;;  %2036 = vmatprep.subr.bf16.mxu0 %v2310_v32  ;;  %v3352_v32 = vrot.slane %v1314_v6, %v3167_v45 }
 0x21a   : > { %2037 = vmatpush3.bf16.msra.mxu0 %v2311_v48  ;;  %2059 = vmatpush3.bf16.msra.mxu1 %v2313_v34  ;;  %v933_v48 = vrot.slane %v3331_v19, %v3165_v44  ;;  %v978_v34 = vmul.f32 %v964_v7, %v3206_v27  ;;  %v3377_v27 = vrot.slane %v1195_v37, %v3160_v42 }
 0x21b   : > { %2038 = vmatprep.subr.bf16.mxu0 %v2314_v50  ;;  %2060 = vmatprep.subr.bf16.mxu1 %v2316_v51 }
 0x21c   : > { %913 = vrot.lane.b32.xlu1 %v3232_v38, %s2687_s14  ;;  %901 = vrot.lane.b32.xlu0 %v3215_v30, %s2687_s14  ;;  %v2320_v38 = vld [vmem:[#allocation12 + $0xe8] sm:$0xff]   ;;  %s1772_s14 = sshll.u32 %s506_s29, 4  ;;  %s3562_s14 = int_to_ptr.vmem [resolvable:$true] %s1772_s14 }
 0x21d   : > { %v2319_v30 = vld [vmem:[#allocation12 + $0x28] sm:$0xff]   ;;  %s2505_s13 = scalar_lea.vmem %s3562_s14, 128  ;;  %p2512_p7 = scmp.lt.s32.totalorder %s3562_s14, %s2510_s2 }
 0x21e   : > { %2039 = vmatpush3.bf16.msra.mxu0 %v2315_v52  ;;  %2061 = vmatpush3.bf16.msra.mxu1 %v2317_v53  ;;  %v979_v52 = vmul.f32 %v968_v8, %v3194_v17  ;;  %v3362_v53 = vrot.slane %v1017_v36, %v3165_v44  ;;  %v929_v17 = vrot.slane %v3331_v19, %v3158_v41  ;;  %p2506_p3 = scmp.ne.s32.totalorder %s3562_s14, %s2505_s13 }
 0x21f   : > { %2040 = vmatprep.subr.bf16.mxu0 %v2318_v54  ;;  %2062 = vmatprep.subr.bf16.mxu1 %v2320_v38  ;;  %v3365_v54 = vrot.slane %v1017_v36, %v3160_v42  ;;  %v3368_v38 = vrot.slane %v1195_v37, %v3165_v44 }
 0x220   : > { %p2507_p1 = pnand %p2506_p3, %p3769_p13 }
 0x222   : > { %2041 = vmatpush3.bf16.msra.mxu0 %v2319_v30  ;;  %2063 = vmatpush3.bf16.msra.mxu1 %v2321_v55  ;;  %p2508_p0 = pneg %p2507_p1 }
 0x223   : > { %2042 = vmatprep.subr.bf16.mxu0 %v2322_v56  ;;  %2064 = vmatprep.subr.bf16.mxu1 %v2324_v57  ;;  %v3384_v56 = vld [vmem:[%s3745_s18] sm:$0xf]  ;;  %v941_v57 = vrot.slane %v3331_v19, %v3167_v45  ;;  %s3767_s18 = sld [smem:[#allocation45_spill]] }
 0x224   : > { %3746 = vst [vmem:[#allocation37_spill] sm:$0xff] %v3384_v56 }
 0x226   : > { %2043 = vmatpush3.bf16.msra.mxu0 %v2323_v58  ;;  %2065 = vmatpush3.bf16.msra.mxu1 %v2325_v59  ;;  %v980_v58 = vmul.f32 %v972_v10, %v3236_v40  ;;  %v3390_v59 = vrot.slane %v1017_v36, %v3158_v41 }
 0x227   : > { %2044 = vmatprep.subr.bf16.mxu0 %v2326_v60  ;;  %2066 = vmatprep.subr.bf16.mxu1 %v2328_v61  ;;  %v3393_v60 = vrot.slane %v1017_v36, %v3167_v45 }
 0x229   : > { %s3768_s28 = smov %s3767_s18  ;;  %s3560_s25 = scalar_lea.hbm %s3767_s18, %s2027_s30 }
 0x22a   : > { %2045 = vmatpush3.bf16.msra.mxu0 %v2327_v62  ;;  %2067 = vmatpush3.bf16.msra.mxu1 %v2329_v63  ;;  %v3398_v62 = vrot.slane %v1195_v37, %v3158_v41  ;;  %v3401_v63 = vrot.slane %v1195_v37, %v3167_v45 }
 0x272   : > { %v3307_v2 = vpop.permute.xlu1 %880  ;;  %v3309_v3 = vpop.permute.xlu0 %872 }
 0x276   : > { %v904_v11 = vpop.permute.xlu1 %903  ;;  %v908_v14 = vpop.permute.xlu0 %907 }
 0x277   : > { %v918_v43 = vsel %vm915_vm8, %v904_v11, %v908_v14 }
 0x278   : > { %v3371_v30 = vmul.f32 %v3321_v12, %v918_v43  ;;  %v3374_v55 = vmul.f32 %v3324_v13, %v918_v43  ;;  %v1009_v4 = vmul.f32 %v995_v9, %v918_v43 }
 0x27a   : > { %v912_v50 = vpop.permute.xlu1 %911  ;;  %v900_v51 = vpop.permute.xlu0 %899 }
 0x27b   : > { %v916_v61 = vsel %vm915_vm8, %v908_v14, %v912_v50  ;;  %v920_v40 = vsel %vm915_vm8, %v900_v51, %v904_v11  ;;  %v922_v19 = vsel %vm915_vm8, %v912_v50, %v900_v51 }
 0x27c   : > { %v1010_v9 = vmul.f32 %v999_v15, %v916_v61  ;;  %v3418_v39 = vmul.f32 %v3329_v18, %v916_v61  ;;  %v3424_v37 = vmul.f32 %v3334_v22, %v916_v61  ;;  %v1008_v43 = vmul.f32 %v991_v23, %v920_v40 }
 0x27d   : > { %v3427_v8 = vmul.f32 %v3341_v31, %v920_v40  ;;  %v1011_v51 = vmul.f32 %v1003_v24, %v922_v19  ;;  %v3430_v7 = vmul.f32 %v3346_v46, %v922_v19 }
 0x27e   : > { %v875_v5 = vpop.permute.xlu1 %874  ;;  %v877_v6 = vpop.permute.xlu0 %876 }
 0x27f   : > { %v893_v16 = vsel %vm890_vm9, %v877_v6, %v3307_v2  ;;  %v895_v11 = vsel %vm890_vm9, %v3309_v3, %v877_v6 }
 0x280   : > { %v948_v36 = vmul.f32 %v937_v49, %v893_v16  ;;  %v947_v50 = vmul.f32 %v933_v48, %v895_v11  ;;  %v1040_v15 = vmul.f32 %v3362_v53, %v895_v11  ;;  %v1041_v14 = vmul.f32 %v3365_v54, %v893_v16 }
 0x281   : > { %v3435_v49 = vmul.f32 %v3349_v47, %v920_v40  ;;  %v3438_v23 = vmul.f32 %v3368_v38, %v895_v11  ;;  %v3441_v6 = vmul.f32 %v3377_v27, %v893_v16  ;;  %v3453_v11 = vmul.f32 %v3352_v32, %v922_v19 }
 0x282   : > { %v883_v10 = vpop.permute.xlu1 %882  ;;  %v885_v42 = vpop.permute.xlu0 %884  ;;  %v983_v61 = vadd.f32 %v979_v52, %v948_v36  ;;  %v982_v48 = vadd.f32 %v978_v34, %v947_v50  ;;  %v1059_v24 = vrot.slane %v1040_v15, 1  ;;  %v1062_v34 = vrot.slane %v1041_v14, 1 }
 0x283   : > { %v891_v45 = vsel %vm890_vm9, %v3307_v2, %v885_v42  ;;  %v897_v35 = vsel %vm890_vm9, %v885_v42, %v3309_v3  ;;  %3747 = vst [vmem:[#allocation38_spill] sm:$0xff] %v3453_v11  ;;  %v1237_v41 = vrot.slane %v3438_v23, 2 }
 0x284   : > { %v946_v16 = vmul.f32 %v929_v17, %v897_v35  ;;  %v949_v50 = vmul.f32 %v941_v57, %v891_v45  ;;  %v1014_v2 = vadd.f32 %v1010_v9, %v983_v61  ;;  %v1013_v40 = vadd.f32 %v1009_v4, %v982_v48 }
 0x285   : > { %v1039_v19 = vmul.f32 %v3390_v59, %v897_v35  ;;  %v1042_v17 = vmul.f32 %v3393_v60, %v891_v45  ;;  %v3465_v57 = vmul.f32 %v3398_v62, %v897_v35 }
 0x286   : > { %v879_v44 = vpop.permute.xlu1 %878  ;;  %v887_v56 = vpop.permute.xlu0 %886  ;;  %v981_v14 = vadd.f32 %v977_v1, %v946_v16  ;;  %v984_v23 = vadd.f32 %v980_v58, %v949_v50 }
 0x287   : > { %v894_v3 = vsel %vm890_vm9, %v879_v44, %v883_v10  ;;  %v896_v15 = vsel %vm890_vm9, %v875_v5, %v879_v44  ;;  %v892_v4 = vsel %vm890_vm9, %v883_v10, %v887_v56  ;;  %v898_v48 = vsel %vm890_vm9, %v887_v56, %v875_v5 }
 0x288   : > { %v1044_v9 = vmul.f32 %v3362_v53, %v896_v15  ;;  %v1045_v61 = vmul.f32 %v3365_v54, %v894_v3  ;;  %v1222_v36 = vmul.f32 %v3368_v38, %v896_v15  ;;  %v1043_v35 = vmul.f32 %v3390_v59, %v898_v48 }
 0x289   : > { %v1046_v16 = vmul.f32 %v3393_v60, %v892_v4  ;;  %v1056_v53 = vrot.slane %v1039_v19, 1  ;;  %v1065_v11 = vrot.slane %v1042_v17, 1  ;;  %v3477_v54 = vmul.f32 %v3401_v63, %v891_v45 }
 0x28a   : > { %v910_v42 = vpop.permute.xlu1 %909  ;;  %v906_v52 = vpop.permute.xlu0 %905  ;;  %v1060_v44 = vrot.slane %v1044_v9, 1  ;;  %v1063_v1 = vrot.slane %v1045_v61, 1  ;;  %v1223_v38 = vmul.f32 %v3377_v27, %v894_v3  ;;  %v1057_v56 = vrot.slane %v1043_v35, 1 }
 0x28b   : > { %v1066_v5 = vrot.slane %v1046_v16, 1  ;;  %v1012_v50 = vadd.f32 %v1008_v43, %v981_v14  ;;  %v1015_v15 = vadd.f32 %v1011_v51, %v984_v23  ;;  %v1234_v59 = vrot.slane %v3465_v57, 2 }
 0x28c   : > { %v1061_v58 = vsel %vm1055_vm6, %v1059_v24, %v1060_v44  ;;  %v1064_v10 = vsel %vm1055_vm6, %v1062_v34, %v1063_v1  ;;  %v1238_v60 = vrot.slane %v1222_v36, 2  ;;  %v1058_v19 = vsel %vm1055_vm6, %v1056_v53, %v1057_v56 }
 0x28d   : > { %v1073_v9 = vadd.f32 %v1061_v58, %v1013_v40  ;;  %v1074_v61 = vadd.f32 %v1064_v10, %v1014_v2  ;;  %v1067_v45 = vsel %vm1055_vm6, %v1065_v11, %v1066_v5  ;;  %v1072_v27 = vadd.f32 %v1058_v19, %v1012_v50 }
 0x28e   : > { %v914_v17 = vpop.permute.xlu1 %913  ;;  %v902_v29 = vpop.permute.xlu0 %901  ;;  %v1075_v3 = vadd.f32 %v1067_v45, %v1015_v15  ;;  %v919_v34 = vsel %vm915_vm8, %v906_v52, %v910_v42  ;;  %v1243_v43 = vrot.slane %v3477_v54, 2  ;;  %v1241_v51 = vrot.slane %v1223_v38, 2 }
 0x28f   : > { %v1132_v24 = vadd.f32 %v3269_v20, %v1073_v9  ;;  %v1221_v40 = vmul.f32 %v3398_v62, %v898_v48  ;;  %v1163_v36 = vmul.f32 %v3321_v12, %v919_v34  ;;  %v917_v2 = vsel %vm915_vm8, %v910_v42, %v914_v17 }
 0x290   : > { %v1133_v11 = vadd.f32 %v3272_v21, %v1074_v61  ;;  %v1134_v14 = vadd.f32 %v3278_v26, %v1075_v3  ;;  %v921_v20 = vsel %vm915_vm8, %v902_v29, %v906_v52  ;;  %v1224_v57 = vmul.f32 %v3401_v63, %v892_v4 }
 0x291   : > { %v1178_v23 = vrot.slane %v1163_v36, 1  ;;  %v1341_v44 = vmul.f32 %v3324_v13, %v919_v34  ;;  %v1164_v1 = vmul.f32 %v3329_v18, %v917_v2  ;;  %v1239_v62 = vsel %vm1233_vm7, %v1237_v41, %v1238_v60  ;;  %v3757_v34 = vld [vmem:[#allocation37_spill] sm:$0xff] }
 0x292   : > { %v923_v12 = vsel %vm915_vm8, %v914_v17, %v902_v29  ;;  %v1131_v42 = vadd.f32 %v3281_v28, %v1072_v27  ;;  %v1162_v21 = vmul.f32 %v3341_v31, %v921_v20  ;;  %v1235_v26 = vrot.slane %v1221_v40, 2 }
 0x293   : > { %v3748_v48 = vrot.slane %v3371_v30, 1  ;;  %v1181_v63 = vrot.slane %v1164_v1, 1  ;;  %v1342_v4 = vmul.f32 %v3334_v22, %v917_v2  ;;  %v1165_v18 = vmul.f32 %v3346_v46, %v923_v12 }
 0x294   : > { %v1175_v35 = vrot.slane %v1162_v21, 1  ;;  %v1340_v41 = vmul.f32 %v3349_v47, %v921_v20  ;;  %v1244_v0 = vrot.slane %v1224_v57, 2  ;;  %v1356_v29 = vrot.slane %v1341_v44, 2  ;;  %v3761_v20 = vld [vmem:[#allocation36_spill] sm:$0xff]  ;;  %v3762_v57 = vld [vmem:[#allocation34_spill] sm:$0xff] }
 0x295   : > { %v1179_v52 = vsel %vm1055_vm6, %v3748_v48, %v1178_v23  ;;  %v3749_v28 = vrot.slane %v3418_v39, 1  ;;  %v1343_v16 = vmul.f32 %v3352_v32, %v923_v12  ;;  %v3750_v54 = vrot.slane %v3427_v8, 1 }
 0x296   : > { %v1191_v13 = vadd.f32 %v1179_v52, %v1132_v24  ;;  %v1184_v38 = vrot.slane %v1165_v18, 1  ;;  %v3751_v46 = vrot.slane %v3441_v6, 2  ;;  %v1236_v47 = vsel %vm1233_vm7, %v1234_v59, %v1235_v26 }
 0x297   : > { %v1182_v31 = vsel %vm1055_vm6, %v3749_v28, %v1181_v63  ;;  %v1176_v22 = vsel %vm1055_vm6, %v3750_v54, %v1175_v35  ;;  %v1359_v10 = vrot.slane %v1342_v4, 2  ;;  %v3752_v5 = vrot.slane %v3430_v7, 1 }
 0x298   : > { %v1251_v30 = vadd.f32 %v1239_v62, %v1191_v13  ;;  %v1192_v53 = vadd.f32 %v1182_v31, %v1133_v11  ;;  %v1242_v58 = vsel %vm1233_vm7, %v3751_v46, %v1241_v51  ;;  %v1190_v56 = vadd.f32 %v1176_v22, %v1131_v42  ;;  %v3758_v51 = vld [vmem:[#allocation38_spill] sm:$0xff]  ;;  %v3763_v62 = vld [vmem:[#allocation32_spill] sm:$0xff] }
 0x299   : > { %v1185_v32 = vsel %vm1055_vm6, %v3752_v5, %v1184_v38  ;;  %v1353_v50 = vrot.slane %v1340_v41, 2  ;;  %v1352_v8 = vrot.slane %v3435_v49, 2  ;;  %v3753_v9 = vrot.slane %v3374_v55, 2  ;;  %v3756_v49 = vld [vmem:[#allocation31_spill] sm:$0xff] }
 0x29a   : > { %v1252_v39 = vadd.f32 %v1242_v58, %v1192_v53  ;;  %v1310_v15 = vadd.f32 %v3287_v33, %v1251_v30  ;;  %v1193_v61 = vadd.f32 %v1185_v32, %v1134_v14  ;;  %v1250_v60 = vadd.f32 %v1236_v47, %v1190_v56  ;;  %v3755_v33 = vld [vmem:[#allocation35_spill] sm:$0xff]  ;;  %v1992_v30 = vld [vmem:[%s3766_s24] ss:$0 sm:$0xff]  ;;  %v2330_v32 = vld [vmem:[#allocation2 + $0x1] sm:$0xff]  ;;  %s2511_s24 = scalar_lea.vmem %s2510_s2, 256 }
 0x29b   : > { %v1357_v6 = vsel %vm1233_vm7, %v3753_v9, %v1356_v29  ;;  %v1245_v59 = vsel %vm1233_vm7, %v1243_v43, %v1244_v0  ;;  %v1362_v45 = vrot.slane %v1343_v16, 2  ;;  %v3754_v7 = vrot.slane %v3424_v37, 2  ;;  %v3759_v43 = vld [vmem:[#allocation33_spill] sm:$0xff]  ;;  %p2513_p2 = scmp.lt.s32.totalorder %s2511_s24, %s2505_s13 }
 0x29c   : > { %v1311_v19 = vadd.f32 %v3275_v25, %v1252_v39  ;;  %v1369_v17 = vadd.f32 %v1357_v6, %v1310_v15  ;;  %v1253_v3 = vadd.f32 %v1245_v59, %v1193_v61  ;;  %v1309_v24 = vadd.f32 %v3755_v33, %v1250_v60 }
 0x29d   : > { %v1360_v27 = vsel %vm1233_vm7, %v3754_v7, %v1359_v10  ;;  %v1377_v55 = vrot.slane %v3757_v34, %v3756_v49  ;;  %v1361_v40 = vrot.slane %v3758_v51, 2  ;;  %v1354_v2 = vsel %vm1233_vm7, %v1352_v8, %v1353_v50  ;;  %p2514_p6 = por %p2513_p2, %p2512_p7 }
 0x29e   : > { %v1370_v36 = vadd.f32 %v1360_v27, %v1311_v19  ;;  %v3760_v25 = vrot.slane %v3757_v34, %v3759_v43  ;;  %v1368_v14 = vadd.f32 %v1354_v2, %v1309_v24  ;;  %v1312_v37 = vadd.f32 %v3761_v20, %v1253_v3 }
 0x29f   : > { %v1389_v23 = vrot.slane %v3757_v34, %v3762_v57  ;;  %v1363_v44 = vsel %vm1233_vm7, %v1361_v40, %v1362_v45  ;;  %v3764_v12 = vrot.slane %v3757_v34, %v3763_v62  ;;  %p2515_p9 = pnand %p2514_p6, %p2508_p0 }
 0x2a0   : > { %v1395_v11 = vadd.f32 %v3760_v25, %v1369_v17  ;;  %v1394_v21 = vadd.f32 %v1377_v55, %v1368_v14  ;;  %v1371_v26 = vadd.f32 %v1363_v44, %v1312_v37 }
 0x2a1   : > { %v1396_v42 = vadd.f32 %v3764_v12, %v1370_v36 }
 0x2a2   : > { %v1399_v1 = vmax.f32 %v1395_v11, 0.0  ;;  %v1398_v63 = vmax.f32 %v1394_v21, 0.0  ;;  %v1397_v4 = vadd.f32 %v1389_v23, %v1371_v26 }
 0x2a3   : > { %v1400_v52 = vmax.f32 %v1396_v42, 0.0 }
 0x2a4   : > { %v1403_v48 = vmin.f32 %v1399_v1, 6.0  ;;  %v1402_v35 = vmin.f32 %v1398_v63, 6.0  ;;  %v1401_v41 = vmax.f32 %v1397_v4, 0.0 }
 0x2a5   : > { %v1404_v18 = vmin.f32 %v1400_v52, 6.0 }
 0x2a6   : > { %v1407_v13 = vpack.c.bf16 %v1403_v48, %v1403_v48  ;;  %v1406_v0 = vpack.c.bf16 %v1402_v35, %v1402_v35  ;;  %v1405_v29 = vmin.f32 %v1401_v41, 6.0 }
 0x2a7   : > { %v1408_v28 = vpack.c.bf16 %v1404_v18, %v1404_v18 }
 0x2a8   : > { %1705 = vmatprep.mubr.bf16.mxu0 %v1407_v13  ;;  %v1409_v31 = vpack.c.bf16 %v1405_v29, %v1405_v29 }
 0x2a9   : > { %1706 = vmatmul.mubr.bf16.vlgmr.msra.gmra.mrb[4].mxu0 %v1406_v0 }
 0x2aa   : > { %1745 = vmatprep.mubr.bf16.mxu1 %v1409_v31 }
 0x2ab   : > { %1746 = vmatmul.mubr.bf16.vlgmr.msra.gmra.mrb[4].mxu1 %v1408_v28 }
 0x37c   : > { %v2046_v16 = vpop.f32.mrb[4].mxu0 }
 0x37d   : > { %v2047_v53 = vpop.f32.mrb[5].mxu0 }
 0x37e   : > { %v2048_v54 = vadd.f32 %v2047_v53, %v2046_v16  ;;  %v2049_v22 = vpop.f32.mrb[6].mxu0  ;;  %v2068_v38 = vpop.f32.mrb[4].mxu1 }
 0x37f   : > { %v2050_v46 = vpop.f32.mrb[7].mxu0  ;;  %v2069_v47 = vpop.f32.mrb[5].mxu1 }
 0x380   : > { %v1708_v58 = vadd.f32 %v2048_v54, %v1992_v30  ;;  %v2070_v10 = vadd.f32 %v2069_v47, %v2068_v38  ;;  %v2071_v56 = vpop.f32.mrb[6].mxu1 }
 0x381   : > { %v2072_v39 = vpop.f32.mrb[7].mxu1 }
 0x382   : > { %v1748_v5 = vadd.f32 %v2070_v10, %v1708_v58 }
 0x384   : > { %v1754_v50 = vadd.f32 %v2330_v32, %v1748_v5 }
 0x386   : > { %1755 = vst [vmem:[%s506_s29] sm:$0xff] %v1754_v50 }
 0x387   : > { %2518 = shalt.err (!%p2515_p9)
}
 0x388   : > { %s2519_s6 = scalar_lea.hbm %s3560_s25, 128  ;;  %s2523_s29 = scalar_lea.hbm %s3768_s28, 512 }
 0x389   : > { %p2520_p12 = scmp.ne.s32.totalorder %s3560_s25, %s2519_s6  ;;  %p2524_p4 = scmp.lt.u32.totalorder %s3560_s25, %s3768_s28 }
 0x38a   : > { %p2525_p8 = scmp.lt.u32.totalorder %s2523_s29, %s2519_s6  ;;  %p2527_p3 = scmp.lt.u32.totalorder %s2519_s6, %s3560_s25 }
 0x38b   : > { %p2521_p10 = pnand %p2520_p12, %p3769_p13 }
 0x38c   : > { %p2526_p11 = por %p2525_p8, %p2524_p4 }
 0x38d   : > { %p2522_p5 = pneg %p2521_p10 }
 0x38e   : > { %p2528_p1 = por %p2527_p3, %p2526_p11 }
 0x390   : > { %p2529_p0 = pnand %p2528_p1, %p2522_p5 }
 0x392   : > { %2532 = shalt.err (!%p2529_p0)
}
 0x393   : > { %2092 = dma.vmem_to_hbm [thread:$0]  (%p3769_p13), %s3562_s14, 128, %s3560_s25, %s1757_s23  }
 0x394 PF: > { %p2125_p7 = scmp.ge.s32.totalorder %s2671_s22, 2  ;;  %s1784_s18 = sand.u32 1, %s2643_s15  }
 0x395   : > { %p3770_p2 = scmp.ne.s32.totalorder %s3708_s4, 0  ;;  %s1785_s13 = scalar_lea.sflag [#allocation5], %s1784_s18 }
 0x397   : > { %p2115_p6 = pnand %p2125_p7, %p3770_p2 }
 0x399   : > { %2610 = dma.done.wait (!%p2115_p6), %s1785_s13, 128  }
 0x39a   : > { %2612 = vsyncadd (!%p2115_p6), %s1785_s13, 4294967168  ;;  %s30_s22 = sadd.s32 1, %s2671_s22   ;;  %s3772_s27 = sld [smem:[#allocation21_spill]] }
 0x39b   : > { %p3591_p9 = scmp.ge.s32.totalorder %s30_s22, 6   ;;  %s3773_s13 = sld [smem:[#allocation22_spill]] }
 0x39c   : > { %s3774_s14 = sld [smem:[#allocation30_spill]]  ;;  %s3775_s4 = sld [smem:[#allocation26_spill]] }
 0x39d   : > { %s3776_s25 = sld [smem:[#allocation27_spill]]  ;;  %s3777_s30 = smov %s2623_s10 }
 0x39e   : > { %s3778_s10 = smov %s2627_s11  ;;  %s3779_s11 = smov %s3070_s12 }
 0x39f   : > { %s3781_s15 = smov %s2647_s16  ;;  %s3782_s16 = smov %s2651_s17 }
 0x3a0   : > { %s3780_s12 = smov %s3772_s27  ;;  %s3783_s17 = smov %s2986_s19 }
 0x3a1   : > { %s3784_s18 = smov %s2663_s20  ;;  %s3785_s19 = smov %s2667_s21 }
 0x3a2   : > { %s3786_s20 = smov %s3775_s4  ;;  %29 = sbr.rel (!%p3591_p9) target bundleno = 22 (0x16), region = 145 }
 0x3a3   : > { %s3787_s21 = smov %s3776_s25 }
 0x3a9   :  { %1790 = vsyncpa [#allocation4], 1 }
 0x3aa   :  { %1792 = vsyncpa [#allocation4 + $0x1], 1 }
 0x3ab   :  { %1793 = vsyncpa [#allocation7], 1 }
 0x3ac   :  { %1795 = vsyncpa [#allocation7 + $0x1], 1 }
 0x3ad   :  { %1796 = vsyncpa [#allocation10], 1 }
 0x3ae   :  { %1797 = vsyncpa [#allocation13], 1 }
 0x3af   :  { %1798 = vsyncpa [#allocation5], 1 }
 0x3b0   :  { %1800 = vsyncpa [#allocation5 + $0x1], 1 }

</bundles_post_ra>
